<compile_context>
chip_gen: v7x
topology: tpu7x:2x2x1
jax: 0.10.0
libtpu: 0.0.40
codegen_flags: <defaults>
</compile_context>

<pallas_src>
import functools

import jax
import jax.numpy as jnp
from jax.experimental import pallas as pl
from jax.experimental.pallas import tpu as pltpu


def _layernorm(x, gamma, beta, eps=1e-5):
    m = jnp.mean(x, axis=-1, keepdims=True)
    v = jnp.mean((x - m) ** 2, axis=-1, keepdims=True)
    return (x - m) * jax.lax.rsqrt(v + eps) * gamma + beta


def transformer_block_kernel(
    x_ref,       # (1, S, E) f32 -- full sequence, resident per batch element
    wq_ref,      # (E, E) bf16  (pre-transposed, 1/sqrt(D) folded in)
    bq_ref,      # (1, E) f32   (1/sqrt(D) folded in)
    wk_ref,      # (E, E) bf16
    bk_ref,      # (1, E) f32
    wv_ref,      # (E, E) bf16
    bv_ref,      # (1, E) f32
    wo_ref,      # (E, E) bf16  (pre-transposed)
    bo_ref,      # (1, E) f32
    w1_ref,      # (E, F) bf16  (pre-transposed)
    b1_ref,      # (1, F) f32
    w2_ref,      # (F, E) bf16  (pre-transposed)
    b2_ref,      # (1, E) f32
    g0_ref,      # (1, E) f32
    beta0_ref,   # (1, E) f32
    g1_ref,      # (1, E) f32
    beta1_ref,   # (1, E) f32
    o_ref,       # (1, TS, E)
    k_scr,       # (S, E) bf16 scratch -- persistent per-batch K
    v_scr,       # (S, E) bf16 scratch -- persistent per-batch V
    attn_scr,    # (TS, E) bf16 scratch -- assembled per-head attention output
    *,
    num_heads,
    exp_bf16,
):
    S, E = x_ref.shape[1], x_ref.shape[2]
    TS = o_ref.shape[1]
    D = E // num_heads
    bf16 = jnp.bfloat16
    f32 = jnp.float32

    # --- K/V projections: computed once per batch element (s == 0 only), kept in
    #     VMEM scratch across the sequence tiles.  Bias-add + bf16 cast fused so
    #     no full-sequence f32 copy stays live.
    @pl.when(pl.program_id(1) == 0)
    def _():
        x_all = x_ref[0].astype(bf16)                          # (S, E)
        k_scr[...] = (jnp.dot(x_all, wk_ref[...], preferred_element_type=f32)
                      + bk_ref[0]).astype(bf16)
        v_scr[...] = (jnp.dot(x_all, wv_ref[...], preferred_element_type=f32)
                      + bv_ref[0]).astype(bf16)

    # --- Query / residual tile, sliced from the resident full-sequence block.
    row0 = pl.multiple_of(pl.program_id(1) * TS, TS)
    xq_f32 = x_ref[0, pl.ds(row0, TS), :]                      # (TS, E) f32 residual
    # 1/sqrt(D) is already folded into wq/bq by prepare_params.
    q_bf = (jnp.dot(xq_f32.astype(bf16), wq_ref[...], preferred_element_type=f32)
            + bq_ref[0]).astype(bf16)                          # (TS, E)

    # --- Per-head attention.  Heads are assembled into attn_scr so the output
    #     projection is a single full-E-depth MXU dot.  Static unroll over H:
    #     each head's (TS,S) intermediates die at the scratch store.
    for h in range(num_heads):
        sl = slice(h * D, (h + 1) * D)
        # Q@K^T via contraction-dim choice (no materialized K transpose).
        scores = jax.lax.dot_general(
            q_bf[:, sl], k_scr[:, sl],
            dimension_numbers=(((1,), (1,)), ((), ())),
            preferred_element_type=f32)                        # (TS, S)
        m = jnp.max(scores, axis=-1, keepdims=True)
        diff = scores - m
        if exp_bf16:
            # v6e/v7x: bf16 exp doubles EUP throughput; row-sum / PV acc stay f32.
            p = jnp.exp(diff.astype(bf16))
            l = jnp.sum(p.astype(f32), axis=-1, keepdims=True)
        else:
            # v5e: EUP has no bf16 -- keep exp in f32.
            p_f32 = jnp.exp(diff)
            l = jnp.sum(p_f32, axis=-1, keepdims=True)
            p = p_f32.astype(bf16)
        inv_l = pl.reciprocal(l, approx=True)
        ho = jnp.dot(p, v_scr[:, sl], preferred_element_type=f32) * inv_l  # (TS, D)
        attn_scr[:, sl] = ho.astype(bf16)

    # --- Output projection: one (TS,E)@(E,E) dot (full MXU depth).
    y = jnp.dot(attn_scr[...], wo_ref[...], preferred_element_type=f32) + bo_ref[0]
    # dropout: identity (eval mode)

    h0 = _layernorm(xq_f32 + y, g0_ref[0], beta0_ref[0])       # f32 residual + LN

    # --- MLP ------------------------------------------------------------------
    ff = jnp.dot(h0.astype(bf16), w1_ref[...], preferred_element_type=f32) + b1_ref[0]
    ff = jnp.maximum(ff, 0.0)                                  # ReLU (f32)
    # dropout inside Sequential: identity (eval mode)
    y2 = jnp.dot(ff.astype(bf16), w2_ref[...], preferred_element_type=f32) + b2_ref[0]
    # dropout: identity (eval mode)

    o_ref[0] = _layernorm(h0 + y2, g1_ref[0], beta1_ref[0]).astype(o_ref.dtype)


def _choose_seq_tile(S):
    # Prefer MXU-friendly multiples of 128; fall back to the full sequence.
    for ts in (512, 256, 128):
        if S % ts == 0:
            return ts
    return S


def _physical_vmem_bytes():
    """Per-core VMEM capacity (v7x: 64 MiB, v5e/v6e: 128 MiB)."""
    try:
        info = pltpu.get_tpu_info()
        cap = getattr(info, "vmem_capacity_bytes", None)
        if cap:
            return int(cap)
    except Exception:
        pass
    kind = jax.devices()[0].device_kind.lower()
    return (64 if "v7" in kind else 128) * 1024 * 1024


def prepare_params(params, num_heads):
    """One-time weight prep: split QKV, transpose, fold softmax scale, cast to bf16."""
    E = params["wo"].shape[0]
    D = E // num_heads
    scale = 1.0 / (D ** 0.5)
    bf16, f32 = jnp.bfloat16, jnp.float32

    wqkv = params["wqkv"]               # (3E, E) PyTorch in_proj layout
    bqkv = params["bqkv"]               # (3E,)
    wq, wk, wv = wqkv[:E], wqkv[E:2 * E], wqkv[2 * E:]
    bq, bk, bv = bqkv[:E], bqkv[E:2 * E], bqkv[2 * E:]

    return {
        "wq_t": (wq.T * scale).astype(bf16),          # (E, E), scale folded in
        "bq":   (bq * scale).reshape(1, E).astype(f32),
        "wk_t": wk.T.astype(bf16),
        "bk":   bk.reshape(1, E).astype(f32),
        "wv_t": wv.T.astype(bf16),
        "bv":   bv.reshape(1, E).astype(f32),
        "wo_t": params["wo"].T.astype(bf16),          # (E, E)
        "bo":   params["bo"].reshape(1, E).astype(f32),
        "w1_t": params["w1"].T.astype(bf16),          # (E, F)
        "b1":   params["b1"].reshape(1, -1).astype(f32),
        "w2_t": params["w2"].T.astype(bf16),          # (F, E)
        "b2":   params["b2"].reshape(1, E).astype(f32),
        "ln0_g": params["ln0_g"].reshape(1, E).astype(f32),
        "ln0_b": params["ln0_b"].reshape(1, E).astype(f32),
        "ln1_g": params["ln1_g"].reshape(1, E).astype(f32),
        "ln1_b": params["ln1_b"].reshape(1, E).astype(f32),
    }


def transformer_block(x, prepared, num_heads, *, seq_tile=None, out_dtype=jnp.float32):
    """x: (B, S, E) float32.  prepared: output of prepare_params (bf16 weights)."""
    B, S, E = x.shape
    assert E % num_heads == 0, "embed_dim must be divisible by num_heads"
    F = prepared["w1_t"].shape[1]
    TS = seq_tile if seq_tile is not None else _choose_seq_tile(S)
    assert S % TS == 0, f"seq_tile {TS} must divide sequence length {S}"
    NS = S // TS

    plist = [prepared[k] for k in (
        "wq_t", "bq", "wk_t", "bk", "wv_t", "bv",
        "wo_t", "bo", "w1_t", "b1", "w2_t", "b2",
        "ln0_g", "ln0_b", "ln1_g", "ln1_b")]

    def full_spec(shape):
        n = len(shape)
        return pl.BlockSpec(shape, lambda b, s, _n=n: (0,) * _n)

    kind = jax.devices()[0].device_kind.lower()
    exp_bf16 = ("v6" in kind) or ("v7" in kind)    # v5e EUP has no bf16

    kernel = functools.partial(transformer_block_kernel,
                               num_heads=num_heads, exp_bf16=exp_bf16)

    # ---- Advisory cost estimate (K/V computed once per batch; x read once/batch).
    flops = int(B * (8 * S * E * E          # Q,K,V,out projections
                     + 4 * S * S * E        # scores + P@V
                     + 4 * S * E * F))      # MLP
    transcendentals = int(B * num_heads * S * S)
    weight_bytes = sum(int(p.size) * p.dtype.itemsize for p in plist)
    out_itemsize = jnp.dtype(out_dtype).itemsize
    bytes_accessed = int(B * S * E * 4            # x (f32), fetched once per batch
                         + B * S * E * out_itemsize
                         + weight_bytes)

    # ---- VMEM budget from the chosen tiles, clamped to the physical capacity.
    x_block = S * E * 4
    out_block = TS * E * 4
    scratch_bytes = 2 * S * E * 2 + TS * E * 2          # K/V + attn scratch (bf16)
    act_bytes = 4 * (2 * TS * S + 6 * TS * E + TS * F) + 2 * S * E
    need = 2 * (x_block + out_block) + 2 * weight_bytes + scratch_bytes + act_bytes
    cap = _physical_vmem_bytes()
    vmem_limit = int(min(max(need + (4 << 20), 32 << 20), cap - (8 << 20)))

    return pl.pallas_call(
        kernel,
        grid=(B, NS),
        in_specs=[
            # Single x stream: full sequence, resident per batch element
            # (query/residual tile is sliced in-kernel; residual stays f32).
            pl.BlockSpec((1, S, E), lambda b, s: (b, 0, 0)),
        ] + [full_spec(p.shape) for p in plist],
        out_specs=pl.BlockSpec((1, TS, E), lambda b, s: (b, s, 0)),
        out_shape=jax.ShapeDtypeStruct((B, S, E), out_dtype),
        scratch_shapes=[
            pltpu.VMEM((S, E), jnp.bfloat16),     # K (persists across seq tiles)
            pltpu.VMEM((S, E), jnp.bfloat16),     # V
            pltpu.VMEM((TS, E), jnp.bfloat16),    # assembled attention output
        ],
        compiler_params=pltpu.CompilerParams(
            # s axis must be "arbitrary": K/V scratch is initialized at s == 0.
            dimension_semantics=("parallel", "arbitrary"),
            vmem_limit_bytes=vmem_limit,
        ),
        cost_estimate=pl.CostEstimate(
            flops=flops,
            transcendentals=transcendentals,
            bytes_accessed=bytes_accessed,
        ),
    )(x.astype(jnp.float32), *plist)


def transformer_block_ref(x, params, num_heads):
    """Pure-JAX f32 reference (mirrors PyTorch eval-mode semantics)."""
    B, S, E = x.shape
    D = E // num_heads
    scale = 1.0 / (D ** 0.5)

    qkv = x @ params["wqkv"].T + params["bqkv"]            # (B, S, 3E)
    q, k, v = jnp.split(qkv, 3, axis=-1)
    q = q.reshape(B, S, num_heads, D).transpose(0, 2, 1, 3)
    k = k.reshape(B, S, num_heads, D).transpose(0, 2, 1, 3)
    v = v.reshape(B, S, num_heads, D).transpose(0, 2, 1, 3)
    s = jnp.einsum("bhqd,bhkd->bhqk", q, k) * scale
    p = jax.nn.softmax(s, axis=-1)
    attn = jnp.einsum("bhqk,bhkd->bhqd", p, v).transpose(0, 2, 1, 3).reshape(B, S, E)
    y = attn @ params["wo"].T + params["bo"]

    def ln(t, g, b):
        m = jnp.mean(t, axis=-1, keepdims=True)
        var = jnp.mean((t - m) ** 2, axis=-1, keepdims=True)
        return (t - m) * jax.lax.rsqrt(var + 1e-5) * g + b

    h0 = ln(x + y, params["ln0_g"], params["ln0_b"])
    ff = jnp.maximum(h0 @ params["w1"].T + params["b1"], 0.0)
    y2 = ff @ params["w2"].T + params["b2"]
    return ln(h0 + y2, params["ln1_g"], params["ln1_b"])


def init_params(key, embed_dim, dim_feedforward):
    E, F = embed_dim, dim_feedforward
    ks = jax.random.split(key, 8)
    std = 0.02
    return {
        "wqkv": std * jax.random.normal(ks[0], (3 * E, E), jnp.float32),
        "bqkv": std * jax.random.normal(ks[1], (3 * E,), jnp.float32),
        "wo": std * jax.random.normal(ks[2], (E, E), jnp.float32),
        "bo": std * jax.random.normal(ks[3], (E,), jnp.float32),
        "w1": std * jax.random.normal(ks[4], (F, E), jnp.float32),
        "b1": std * jax.random.normal(ks[5], (F,), jnp.float32),
        "w2": std * jax.random.normal(ks[6], (E, F), jnp.float32),
        "b2": std * jax.random.normal(ks[7], (E,), jnp.float32),
        "ln0_g": jnp.ones((E,), jnp.float32),
        "ln0_b": jnp.zeros((E,), jnp.float32),
        "ln1_g": jnp.ones((E,), jnp.float32),
        "ln1_b": jnp.zeros((E,), jnp.float32),
    }


if __name__ == "__main__":
    key = jax.random.PRNGKey(0)
    k1, k2, k3, k4 = jax.random.split(key, 4)

    def run_case(B, S, E, H, FF, kx, kp, seq_tile=None):
        x = jax.random.normal(kx, (B, S, E), jnp.float32)
        params = init_params(kp, E, FF)
        prepared = prepare_params(params, num_heads=H)   # one-time bf16 weight prep
        out = transformer_block(x, prepared, num_heads=H, seq_tile=seq_tile)
        out = jax.block_until_ready(out)
        ref = transformer_block_ref(x, params, num_heads=H)
        assert out.shape == (B, S, E)
        # bf16 MXU operands (+ bf16 exp on v6e/v7x) vs. f32 reference: LayerNorm
        # keeps outputs O(1), so 5e-2 comfortably bounds the rounding error.
        assert jnp.allclose(out, ref, atol=5e-2, rtol=5e-2), \
            f"mismatch vs reference at B={B}, S={S}, E={E}, H={H}"

    # Tiny smoke shape (module-consistent small sizes).
    run_case(B=2, S=8, E=32, H=4, FF=64, kx=k1, kp=k2)
    # Modest MXU-relevant shape with NS=2: exercises the persistent K/V scratch
    # reuse path (s > 0), E multiple of 128, D=64, aligned sequence tiles.
    run_case(B=2, S=256, E=256, H=4, FF=512, kx=k3, kp=k4, seq_tile=128)

    print("KERNEL_OK")
</pallas_src>

<mosaic_0001>
module attributes {stable_mosaic.version = 11 : i64} {
  func.func @transformer_block_kernel(%arg0: i32, %arg1: i32, %arg2: memref<1x8x32xf32, #tpu.memory_space<vmem>>, %arg3: memref<32x32xbf16, #tpu.memory_space<vmem>>, %arg4: memref<1x32xf32, #tpu.memory_space<vmem>>, %arg5: memref<32x32xbf16, #tpu.memory_space<vmem>>, %arg6: memref<1x32xf32, #tpu.memory_space<vmem>>, %arg7: memref<32x32xbf16, #tpu.memory_space<vmem>>, %arg8: memref<1x32xf32, #tpu.memory_space<vmem>>, %arg9: memref<32x32xbf16, #tpu.memory_space<vmem>>, %arg10: memref<1x32xf32, #tpu.memory_space<vmem>>, %arg11: memref<32x64xbf16, #tpu.memory_space<vmem>>, %arg12: memref<1x64xf32, #tpu.memory_space<vmem>>, %arg13: memref<64x32xbf16, #tpu.memory_space<vmem>>, %arg14: memref<1x32xf32, #tpu.memory_space<vmem>>, %arg15: memref<1x32xf32, #tpu.memory_space<vmem>>, %arg16: memref<1x32xf32, #tpu.memory_space<vmem>>, %arg17: memref<1x32xf32, #tpu.memory_space<vmem>>, %arg18: memref<1x32xf32, #tpu.memory_space<vmem>>, %arg19: memref<1x8x32xf32, #tpu.memory_space<vmem>>, %arg20: memref<8x32xbf16, #tpu.memory_space<vmem>>, %arg21: memref<8x32xbf16, #tpu.memory_space<vmem>>, %arg22: memref<8x32xbf16, #tpu.memory_space<vmem>>) attributes {dimension_semantics = [#tpu.dimension_semantics<parallel>, #tpu.dimension_semantics<arbitrary>], iteration_bounds = array<i64: 2, 1>, scalar_prefetch = 0 : i64, scratch_operands = 3 : i64, tpu.core_type = #tpu.core_type<tc>, window_params = [{transform_indices = @transform_0, window_bounds = array<i64: 1, 8, 32>}, {pipeline_mode = #tpu.pipeline_mode<synchronous>, transform_indices = @transform_1, window_bounds = array<i64: 32, 32>}, {pipeline_mode = #tpu.pipeline_mode<synchronous>, transform_indices = @transform_2, window_bounds = array<i64: 1, 32>}, {pipeline_mode = #tpu.pipeline_mode<synchronous>, transform_indices = @transform_3, window_bounds = array<i64: 32, 32>}, {pipeline_mode = #tpu.pipeline_mode<synchronous>, transform_indices = @transform_4, window_bounds = array<i64: 1, 32>}, {pipeline_mode = #tpu.pipeline_mode<synchronous>, transform_indices = @transform_5, window_bounds = array<i64: 32, 32>}, {pipeline_mode = #tpu.pipeline_mode<synchronous>, transform_indices = @transform_6, window_bounds = array<i64: 1, 32>}, {pipeline_mode = #tpu.pipeline_mode<synchronous>, transform_indices = @transform_7, window_bounds = array<i64: 32, 32>}, {pipeline_mode = #tpu.pipeline_mode<synchronous>, transform_indices = @transform_8, window_bounds = array<i64: 1, 32>}, {pipeline_mode = #tpu.pipeline_mode<synchronous>, transform_indices = @transform_9, window_bounds = array<i64: 32, 64>}, {pipeline_mode = #tpu.pipeline_mode<synchronous>, transform_indices = @transform_10, window_bounds = array<i64: 1, 64>}, {pipeline_mode = #tpu.pipeline_mode<synchronous>, transform_indices = @transform_11, window_bounds = array<i64: 64, 32>}, {pipeline_mode = #tpu.pipeline_mode<synchronous>, transform_indices = @transform_12, window_bounds = array<i64: 1, 32>}, {pipeline_mode = #tpu.pipeline_mode<synchronous>, transform_indices = @transform_13, window_bounds = array<i64: 1, 32>}, {pipeline_mode = #tpu.pipeline_mode<synchronous>, transform_indices = @transform_14, window_bounds = array<i64: 1, 32>}, {pipeline_mode = #tpu.pipeline_mode<synchronous>, transform_indices = @transform_15, window_bounds = array<i64: 1, 32>}, {pipeline_mode = #tpu.pipeline_mode<synchronous>, transform_indices = @transform_16, window_bounds = array<i64: 1, 32>}, {transform_indices = @transform_17, window_bounds = array<i64: 1, 8, 32>}]} {
    %c0_i32 = arith.constant 0 : i32
    %0 = arith.cmpi eq, %arg1, %c0_i32 : i32
    %1 = arith.extui %0 : i1 to i32
    %c0_i32_0 = arith.constant 0 : i32
    %2 = arith.cmpi ne, %1, %c0_i32_0 : i32
    scf.if %2 {
      %c0_82 = arith.constant 0 : index
      %c0_83 = arith.constant 0 : index
      %c0_84 = arith.constant 0 : index
      %176 = vector.load %arg2[%c0_82, %c0_83, %c0_84] : memref<1x8x32xf32, #tpu.memory_space<vmem>>, vector<1x8x32xf32>
      %177 = vector.shape_cast %176 : vector<1x8x32xf32> to vector<8x32xf32>
      %178 = arith.truncf %177 : vector<8x32xf32> to vector<8x32xbf16>
      %c0_85 = arith.constant 0 : index
      %c0_86 = arith.constant 0 : index
      %179 = vector.load %arg5[%c0_85, %c0_86] : memref<32x32xbf16, #tpu.memory_space<vmem>>, vector<32x32xbf16>
      %cst_87 = arith.constant dense<0.000000e+00> : vector<8x32xf32>
      %180 = tpu.matmul %178, %179, %cst_87 {dimension_numbers = #tpu.dot_dimension_numbers<[1], [0], [0], [1], [0, 0, 1, 1], [], []>} : vector<8x32xbf16>, vector<32x32xbf16>, vector<8x32xf32> -> vector<8x32xf32>
      %c0_88 = arith.constant 0 : index
      %c0_89 = arith.constant 0 : index
      %181 = vector.load %arg6[%c0_88, %c0_89] : memref<1x32xf32, #tpu.memory_space<vmem>>, vector<1x32xf32>
      %182 = vector.shape_cast %181 : vector<1x32xf32> to vector<32xf32>
      %183 = vector.shape_cast %182 : vector<32xf32> to vector<1x32xf32>
      %184 = vector.broadcast %183 : vector<1x32xf32> to vector<8x32xf32>
      %185 = arith.addf %180, %184 : vector<8x32xf32>
      %186 = arith.truncf %185 : vector<8x32xf32> to vector<8x32xbf16>
      %c0_90 = arith.constant 0 : index
      %c0_91 = arith.constant 0 : index
      %187 = vector.load %arg20[%c0_90, %c0_91] : memref<8x32xbf16, #tpu.memory_space<vmem>>, vector<8x32xbf16>
      tpu.vector_store %arg20[%c0_90, %c0_91], %186 {strides = array<i32>} : memref<8x32xbf16, #tpu.memory_space<vmem>>, vector<8x32xbf16>,
      %c0_92 = arith.constant 0 : index
      %c0_93 = arith.constant 0 : index
      %188 = vector.load %arg7[%c0_92, %c0_93] : memref<32x32xbf16, #tpu.memory_space<vmem>>, vector<32x32xbf16>
      %cst_94 = arith.constant dense<0.000000e+00> : vector<8x32xf32>
      %189 = tpu.matmul %178, %188, %cst_94 {dimension_numbers = #tpu.dot_dimension_numbers<[1], [0], [0], [1], [0, 0, 1, 1], [], []>} : vector<8x32xbf16>, vector<32x32xbf16>, vector<8x32xf32> -> vector<8x32xf32>
      %c0_95 = arith.constant 0 : index
      %c0_96 = arith.constant 0 : index
      %190 = vector.load %arg8[%c0_95, %c0_96] : memref<1x32xf32, #tpu.memory_space<vmem>>, vector<1x32xf32>
      %191 = vector.shape_cast %190 : vector<1x32xf32> to vector<32xf32>
      %192 = vector.shape_cast %191 : vector<32xf32> to vector<1x32xf32>
      %193 = vector.broadcast %192 : vector<1x32xf32> to vector<8x32xf32>
      %194 = arith.addf %189, %193 : vector<8x32xf32>
      %195 = arith.truncf %194 : vector<8x32xf32> to vector<8x32xbf16>
      %c0_97 = arith.constant 0 : index
      %c0_98 = arith.constant 0 : index
      %196 = vector.load %arg21[%c0_97, %c0_98] : memref<8x32xbf16, #tpu.memory_space<vmem>>, vector<8x32xbf16>
      tpu.vector_store %arg21[%c0_97, %c0_98], %195 {strides = array<i32>} : memref<8x32xbf16, #tpu.memory_space<vmem>>, vector<8x32xbf16>,
    } else {
    }
    %c8_i32 = arith.constant 8 : i32
    %3 = arith.muli %arg1, %c8_i32 : i32
    %4 = tpu.assume_multiple %3, 8 : i32
    %c0 = arith.constant 0 : index
    %5 = arith.index_cast %4 : i32 to index
    %c0_1 = arith.constant 0 : index
    %6 = vector.load %arg2[%c0, %5, %c0_1] : memref<1x8x32xf32, #tpu.memory_space<vmem>>, vector<1x8x32xf32>
    %7 = vector.shape_cast %6 : vector<1x8x32xf32> to vector<8x32xf32>
    %8 = arith.truncf %7 : vector<8x32xf32> to vector<8x32xbf16>
    %c0_2 = arith.constant 0 : index
    %c0_3 = arith.constant 0 : index
    %9 = vector.load %arg3[%c0_2, %c0_3] : memref<32x32xbf16, #tpu.memory_space<vmem>>, vector<32x32xbf16>
    %cst = arith.constant dense<0.000000e+00> : vector<8x32xf32>
    %10 = tpu.matmul %8, %9, %cst {dimension_numbers = #tpu.dot_dimension_numbers<[1], [0], [0], [1], [0, 0, 1, 1], [], []>} : vector<8x32xbf16>, vector<32x32xbf16>, vector<8x32xf32> -> vector<8x32xf32>
    %c0_4 = arith.constant 0 : index
    %c0_5 = arith.constant 0 : index
    %11 = vector.load %arg4[%c0_4, %c0_5] : memref<1x32xf32, #tpu.memory_space<vmem>>, vector<1x32xf32>
    %12 = vector.shape_cast %11 : vector<1x32xf32> to vector<32xf32>
    %13 = vector.shape_cast %12 : vector<32xf32> to vector<1x32xf32>
    %14 = vector.broadcast %13 : vector<1x32xf32> to vector<8x32xf32>
    %15 = arith.addf %10, %14 : vector<8x32xf32>
    %16 = arith.truncf %15 : vector<8x32xf32> to vector<8x32xbf16>
    %17 = vector.extract_strided_slice %16 {offsets = [0, 0], sizes = [8, 8], strides = [1, 1]} : vector<8x32xbf16> to vector<8x8xbf16>
    %c0_6 = arith.constant 0 : index
    %c0_7 = arith.constant 0 : index
    %18 = vector.load %arg20[%c0_6, %c0_7] : memref<8x32xbf16, #tpu.memory_space<vmem>>, vector<8x8xbf16>
    %cst_8 = arith.constant dense<0.000000e+00> : vector<8x8xf32>
    %19 = tpu.matmul %17, %18, %cst_8 {dimension_numbers = #tpu.dot_dimension_numbers<[1], [1], [0], [0], [0, 0, 1, 0], [], []>} : vector<8x8xbf16>, vector<8x8xbf16>, vector<8x8xf32> -> vector<8x8xf32>
    %cst_9 = arith.constant dense<0xFF800000> : vector<8xf32>
    %20 = vector.multi_reduction <maximumf>, %19, %cst_9 [1] : vector<8x8xf32> to vector<8xf32>
    %21 = vector.shape_cast %20 : vector<8xf32> to vector<8x1xf32>
    %22 = vector.broadcast %21 : vector<8x1xf32> to vector<8x8xf32>
    %23 = arith.subf %19, %22 : vector<8x8xf32>
    %24 = math.exp %23 : vector<8x8xf32>
    %cst_10 = arith.constant dense<0.000000e+00> : vector<8xf32>
    %25 = vector.multi_reduction <add>, %24, %cst_10 [1] : vector<8x8xf32> to vector<8xf32>
    %26 = vector.shape_cast %25 : vector<8xf32> to vector<8x1xf32>
    %27 = arith.truncf %24 : vector<8x8xf32> to vector<8x8xbf16>
    %28 = tpu.reciprocal %26 {approx = true} : vector<8x1xf32> -> vector<8x1xf32>
    %c0_11 = arith.constant 0 : index
    %c0_12 = arith.constant 0 : index
    %29 = vector.load %arg21[%c0_11, %c0_12] : memref<8x32xbf16, #tpu.memory_space<vmem>>, vector<8x8xbf16>
    %cst_13 = arith.constant dense<0.000000e+00> : vector<8x8xf32>
    %30 = tpu.matmul %27, %29, %cst_13 {dimension_numbers = #tpu.dot_dimension_numbers<[1], [0], [0], [1], [0, 0, 1, 1], [], []>} : vector<8x8xbf16>, vector<8x8xbf16>, vector<8x8xf32> -> vector<8x8xf32>
    %31 = vector.broadcast %28 : vector<8x1xf32> to vector<8x8xf32>
    %32 = arith.mulf %30, %31 : vector<8x8xf32>
    %33 = arith.truncf %32 : vector<8x8xf32> to vector<8x8xbf16>
    %c0_14 = arith.constant 0 : index
    %c0_15 = arith.constant 0 : index
    %34 = vector.load %arg22[%c0_14, %c0_15] : memref<8x32xbf16, #tpu.memory_space<vmem>>, vector<8x8xbf16>
    tpu.vector_store %arg22[%c0_14, %c0_15], %33 {strides = array<i32>} : memref<8x32xbf16, #tpu.memory_space<vmem>>, vector<8x8xbf16>,
    %35 = vector.extract_strided_slice %16 {offsets = [0, 8], sizes = [8, 8], strides = [1, 1]} : vector<8x32xbf16> to vector<8x8xbf16>
    %c0_16 = arith.constant 0 : index
    %c8 = arith.constant 8 : index
    %36 = vector.load %arg20[%c0_16, %c8] : memref<8x32xbf16, #tpu.memory_space<vmem>>, vector<8x8xbf16>
    %cst_17 = arith.constant dense<0.000000e+00> : vector<8x8xf32>
    %37 = tpu.matmul %35, %36, %cst_17 {dimension_numbers = #tpu.dot_dimension_numbers<[1], [1], [0], [0], [0, 0, 1, 0], [], []>} : vector<8x8xbf16>, vector<8x8xbf16>, vector<8x8xf32> -> vector<8x8xf32>
    %cst_18 = arith.constant dense<0xFF800000> : vector<8xf32>
    %38 = vector.multi_reduction <maximumf>, %37, %cst_18 [1] : vector<8x8xf32> to vector<8xf32>
    %39 = vector.shape_cast %38 : vector<8xf32> to vector<8x1xf32>
    %40 = vector.broadcast %39 : vector<8x1xf32> to vector<8x8xf32>
    %41 = arith.subf %37, %40 : vector<8x8xf32>
    %42 = math.exp %41 : vector<8x8xf32>
    %cst_19 = arith.constant dense<0.000000e+00> : vector<8xf32>
    %43 = vector.multi_reduction <add>, %42, %cst_19 [1] : vector<8x8xf32> to vector<8xf32>
    %44 = vector.shape_cast %43 : vector<8xf32> to vector<8x1xf32>
    %45 = arith.truncf %42 : vector<8x8xf32> to vector<8x8xbf16>
    %46 = tpu.reciprocal %44 {approx = true} : vector<8x1xf32> -> vector<8x1xf32>
    %c0_20 = arith.constant 0 : index
    %c8_21 = arith.constant 8 : index
    %47 = vector.load %arg21[%c0_20, %c8_21] : memref<8x32xbf16, #tpu.memory_space<vmem>>, vector<8x8xbf16>
    %cst_22 = arith.constant dense<0.000000e+00> : vector<8x8xf32>
    %48 = tpu.matmul %45, %47, %cst_22 {dimension_numbers = #tpu.dot_dimension_numbers<[1], [0], [0], [1], [0, 0, 1, 1], [], []>} : vector<8x8xbf16>, vector<8x8xbf16>, vector<8x8xf32> -> vector<8x8xf32>
    %49 = vector.broadcast %46 : vector<8x1xf32> to vector<8x8xf32>
    %50 = arith.mulf %48, %49 : vector<8x8xf32>
    %51 = arith.truncf %50 : vector<8x8xf32> to vector<8x8xbf16>
    %c0_23 = arith.constant 0 : index
    %c8_24 = arith.constant 8 : index
    %52 = vector.load %arg22[%c0_23, %c8_24] : memref<8x32xbf16, #tpu.memory_space<vmem>>, vector<8x8xbf16>
    tpu.vector_store %arg22[%c0_23, %c8_24], %51 {strides = array<i32>} : memref<8x32xbf16, #tpu.memory_space<vmem>>, vector<8x8xbf16>,
    %53 = vector.extract_strided_slice %16 {offsets = [0, 16], sizes = [8, 8], strides = [1, 1]} : vector<8x32xbf16> to vector<8x8xbf16>
    %c0_25 = arith.constant 0 : index
    %c16 = arith.constant 16 : index
    %54 = vector.load %arg20[%c0_25, %c16] : memref<8x32xbf16, #tpu.memory_space<vmem>>, vector<8x8xbf16>
    %cst_26 = arith.constant dense<0.000000e+00> : vector<8x8xf32>
    %55 = tpu.matmul %53, %54, %cst_26 {dimension_numbers = #tpu.dot_dimension_numbers<[1], [1], [0], [0], [0, 0, 1, 0], [], []>} : vector<8x8xbf16>, vector<8x8xbf16>, vector<8x8xf32> -> vector<8x8xf32>
    %cst_27 = arith.constant dense<0xFF800000> : vector<8xf32>
    %56 = vector.multi_reduction <maximumf>, %55, %cst_27 [1] : vector<8x8xf32> to vector<8xf32>
    %57 = vector.shape_cast %56 : vector<8xf32> to vector<8x1xf32>
    %58 = vector.broadcast %57 : vector<8x1xf32> to vector<8x8xf32>
    %59 = arith.subf %55, %58 : vector<8x8xf32>
    %60 = math.exp %59 : vector<8x8xf32>
    %cst_28 = arith.constant dense<0.000000e+00> : vector<8xf32>
    %61 = vector.multi_reduction <add>, %60, %cst_28 [1] : vector<8x8xf32> to vector<8xf32>
    %62 = vector.shape_cast %61 : vector<8xf32> to vector<8x1xf32>
    %63 = arith.truncf %60 : vector<8x8xf32> to vector<8x8xbf16>
    %64 = tpu.reciprocal %62 {approx = true} : vector<8x1xf32> -> vector<8x1xf32>
    %c0_29 = arith.constant 0 : index
    %c16_30 = arith.constant 16 : index
    %65 = vector.load %arg21[%c0_29, %c16_30] : memref<8x32xbf16, #tpu.memory_space<vmem>>, vector<8x8xbf16>
    %cst_31 = arith.constant dense<0.000000e+00> : vector<8x8xf32>
    %66 = tpu.matmul %63, %65, %cst_31 {dimension_numbers = #tpu.dot_dimension_numbers<[1], [0], [0], [1], [0, 0, 1, 1], [], []>} : vector<8x8xbf16>, vector<8x8xbf16>, vector<8x8xf32> -> vector<8x8xf32>
    %67 = vector.broadcast %64 : vector<8x1xf32> to vector<8x8xf32>
    %68 = arith.mulf %66, %67 : vector<8x8xf32>
    %69 = arith.truncf %68 : vector<8x8xf32> to vector<8x8xbf16>
    %c0_32 = arith.constant 0 : index
    %c16_33 = arith.constant 16 : index
    %70 = vector.load %arg22[%c0_32, %c16_33] : memref<8x32xbf16, #tpu.memory_space<vmem>>, vector<8x8xbf16>
    tpu.vector_store %arg22[%c0_32, %c16_33], %69 {strides = array<i32>} : memref<8x32xbf16, #tpu.memory_space<vmem>>, vector<8x8xbf16>,
    %71 = vector.extract_strided_slice %16 {offsets = [0, 24], sizes = [8, 8], strides = [1, 1]} : vector<8x32xbf16> to vector<8x8xbf16>
    %c0_34 = arith.constant 0 : index
    %c24 = arith.constant 24 : index
    %72 = vector.load %arg20[%c0_34, %c24] : memref<8x32xbf16, #tpu.memory_space<vmem>>, vector<8x8xbf16>
    %cst_35 = arith.constant dense<0.000000e+00> : vector<8x8xf32>
    %73 = tpu.matmul %71, %72, %cst_35 {dimension_numbers = #tpu.dot_dimension_numbers<[1], [1], [0], [0], [0, 0, 1, 0], [], []>} : vector<8x8xbf16>, vector<8x8xbf16>, vector<8x8xf32> -> vector<8x8xf32>
    %cst_36 = arith.constant dense<0xFF800000> : vector<8xf32>
    %74 = vector.multi_reduction <maximumf>, %73, %cst_36 [1] : vector<8x8xf32> to vector<8xf32>
    %75 = vector.shape_cast %74 : vector<8xf32> to vector<8x1xf32>
    %76 = vector.broadcast %75 : vector<8x1xf32> to vector<8x8xf32>
    %77 = arith.subf %73, %76 : vector<8x8xf32>
    %78 = math.exp %77 : vector<8x8xf32>
    %cst_37 = arith.constant dense<0.000000e+00> : vector<8xf32>
    %79 = vector.multi_reduction <add>, %78, %cst_37 [1] : vector<8x8xf32> to vector<8xf32>
    %80 = vector.shape_cast %79 : vector<8xf32> to vector<8x1xf32>
    %81 = arith.truncf %78 : vector<8x8xf32> to vector<8x8xbf16>
    %82 = tpu.reciprocal %80 {approx = true} : vector<8x1xf32> -> vector<8x1xf32>
    %c0_38 = arith.constant 0 : index
    %c24_39 = arith.constant 24 : index
    %83 = vector.load %arg21[%c0_38, %c24_39] : memref<8x32xbf16, #tpu.memory_space<vmem>>, vector<8x8xbf16>
    %cst_40 = arith.constant dense<0.000000e+00> : vector<8x8xf32>
    %84 = tpu.matmul %81, %83, %cst_40 {dimension_numbers = #tpu.dot_dimension_numbers<[1], [0], [0], [1], [0, 0, 1, 1], [], []>} : vector<8x8xbf16>, vector<8x8xbf16>, vector<8x8xf32> -> vector<8x8xf32>
    %85 = vector.broadcast %82 : vector<8x1xf32> to vector<8x8xf32>
    %86 = arith.mulf %84, %85 : vector<8x8xf32>
    %87 = arith.truncf %86 : vector<8x8xf32> to vector<8x8xbf16>
    %c0_41 = arith.constant 0 : index
    %c24_42 = arith.constant 24 : index
    %88 = vector.load %arg22[%c0_41, %c24_42] : memref<8x32xbf16, #tpu.memory_space<vmem>>, vector<8x8xbf16>
    tpu.vector_store %arg22[%c0_41, %c24_42], %87 {strides = array<i32>} : memref<8x32xbf16, #tpu.memory_space<vmem>>, vector<8x8xbf16>,
    %c0_43 = arith.constant 0 : index
    %c0_44 = arith.constant 0 : index
    %89 = vector.load %arg22[%c0_43, %c0_44] : memref<8x32xbf16, #tpu.memory_space<vmem>>, vector<8x32xbf16>
    %c0_45 = arith.constant 0 : index
    %c0_46 = arith.constant 0 : index
    %90 = vector.load %arg9[%c0_45, %c0_46] : memref<32x32xbf16, #tpu.memory_space<vmem>>, vector<32x32xbf16>
    %cst_47 = arith.constant dense<0.000000e+00> : vector<8x32xf32>
    %91 = tpu.matmul %89, %90, %cst_47 {dimension_numbers = #tpu.dot_dimension_numbers<[1], [0], [0], [1], [0, 0, 1, 1], [], []>} : vector<8x32xbf16>, vector<32x32xbf16>, vector<8x32xf32> -> vector<8x32xf32>
    %c0_48 = arith.constant 0 : index
    %c0_49 = arith.constant 0 : index
    %92 = vector.load %arg10[%c0_48, %c0_49] : memref<1x32xf32, #tpu.memory_space<vmem>>, vector<1x32xf32>
    %93 = vector.shape_cast %92 : vector<1x32xf32> to vector<32xf32>
    %94 = vector.shape_cast %93 : vector<32xf32> to vector<1x32xf32>
    %95 = vector.broadcast %94 : vector<1x32xf32> to vector<8x32xf32>
    %96 = arith.addf %91, %95 : vector<8x32xf32>
    %97 = arith.addf %7, %96 : vector<8x32xf32>
    %c0_50 = arith.constant 0 : index
    %c0_51 = arith.constant 0 : index
    %98 = vector.load %arg15[%c0_50, %c0_51] : memref<1x32xf32, #tpu.memory_space<vmem>>, vector<1x32xf32>
    %99 = vector.shape_cast %98 : vector<1x32xf32> to vector<32xf32>
    %c0_52 = arith.constant 0 : index
    %c0_53 = arith.constant 0 : index
    %100 = vector.load %arg16[%c0_52, %c0_53] : memref<1x32xf32, #tpu.memory_space<vmem>>, vector<1x32xf32>
    %101 = vector.shape_cast %100 : vector<1x32xf32> to vector<32xf32>
    %cst_54 = arith.constant dense<0.000000e+00> : vector<8xf32>
    %102 = vector.multi_reduction <add>, %97, %cst_54 [1] : vector<8x32xf32> to vector<8xf32>
    %103 = vector.shape_cast %102 : vector<8xf32> to vector<8x1xf32>
    %cst_55 = arith.constant 3.200000e+01 : f32
    %104 = vector.broadcast %cst_55 : f32 to vector<8x1xf32>
    %105 = arith.divf %103, %104 : vector<8x1xf32>
    %106 = vector.broadcast %105 : vector<8x1xf32> to vector<8x32xf32>
    %107 = arith.subf %97, %106 : vector<8x32xf32>
    %108 = arith.mulf %107, %107 : vector<8x32xf32>
    %cst_56 = arith.constant dense<0.000000e+00> : vector<8xf32>
    %109 = vector.multi_reduction <add>, %108, %cst_56 [1] : vector<8x32xf32> to vector<8xf32>
    %110 = vector.shape_cast %109 : vector<8xf32> to vector<8x1xf32>
    %cst_57 = arith.constant 3.200000e+01 : f32
    %111 = vector.broadcast %cst_57 : f32 to vector<8x1xf32>
    %112 = arith.divf %110, %111 : vector<8x1xf32>
    %113 = vector.broadcast %105 : vector<8x1xf32> to vector<8x32xf32>
    %114 = arith.subf %97, %113 : vector<8x32xf32>
    %cst_58 = arith.constant 9.99999974E-6 : f32
    %115 = vector.broadcast %cst_58 : f32 to vector<8x1xf32>
    %116 = arith.addf %112, %115 : vector<8x1xf32>
    %117 = math.rsqrt %116 : vector<8x1xf32>
    %118 = vector.broadcast %117 : vector<8x1xf32> to vector<8x32xf32>
    %119 = arith.mulf %114, %118 : vector<8x32xf32>
    %120 = vector.shape_cast %99 : vector<32xf32> to vector<1x32xf32>
    %121 = vector.broadcast %120 : vector<1x32xf32> to vector<8x32xf32>
    %122 = arith.mulf %119, %121 : vector<8x32xf32>
    %123 = vector.shape_cast %101 : vector<32xf32> to vector<1x32xf32>
    %124 = vector.broadcast %123 : vector<1x32xf32> to vector<8x32xf32>
    %125 = arith.addf %122, %124 : vector<8x32xf32>
    %126 = arith.truncf %125 : vector<8x32xf32> to vector<8x32xbf16>
    %c0_59 = arith.constant 0 : index
    %c0_60 = arith.constant 0 : index
    %127 = vector.load %arg11[%c0_59, %c0_60] : memref<32x64xbf16, #tpu.memory_space<vmem>>, vector<32x64xbf16>
    %cst_61 = arith.constant dense<0.000000e+00> : vector<8x64xf32>
    %128 = tpu.matmul %126, %127, %cst_61 {dimension_numbers = #tpu.dot_dimension_numbers<[1], [0], [0], [1], [0, 0, 1, 1], [], []>} : vector<8x32xbf16>, vector<32x64xbf16>, vector<8x64xf32> -> vector<8x64xf32>
    %c0_62 = arith.constant 0 : index
    %c0_63 = arith.constant 0 : index
    %129 = vector.load %arg12[%c0_62, %c0_63] : memref<1x64xf32, #tpu.memory_space<vmem>>, vector<1x64xf32>
    %130 = vector.shape_cast %129 : vector<1x64xf32> to vector<64xf32>
    %131 = vector.shape_cast %130 : vector<64xf32> to vector<1x64xf32>
    %132 = vector.broadcast %131 : vector<1x64xf32> to vector<8x64xf32>
    %133 = arith.addf %128, %132 : vector<8x64xf32>
    %cst_64 = arith.constant 0.000000e+00 : f32
    %134 = vector.broadcast %cst_64 : f32 to vector<8x64xf32>
    %135 = arith.maximumf %133, %134 : vector<8x64xf32>
    %136 = arith.truncf %135 : vector<8x64xf32> to vector<8x64xbf16>
    %c0_65 = arith.constant 0 : index
    %c0_66 = arith.constant 0 : index
    %137 = vector.load %arg13[%c0_65, %c0_66] : memref<64x32xbf16, #tpu.memory_space<vmem>>, vector<64x32xbf16>
    %cst_67 = arith.constant dense<0.000000e+00> : vector<8x32xf32>
    %138 = tpu.matmul %136, %137, %cst_67 {dimension_numbers = #tpu.dot_dimension_numbers<[1], [0], [0], [1], [0, 0, 1, 1], [], []>} : vector<8x64xbf16>, vector<64x32xbf16>, vector<8x32xf32> -> vector<8x32xf32>
    %c0_68 = arith.constant 0 : index
    %c0_69 = arith.constant 0 : index
    %139 = vector.load %arg14[%c0_68, %c0_69] : memref<1x32xf32, #tpu.memory_space<vmem>>, vector<1x32xf32>
    %140 = vector.shape_cast %139 : vector<1x32xf32> to vector<32xf32>
    %141 = vector.shape_cast %140 : vector<32xf32> to vector<1x32xf32>
    %142 = vector.broadcast %141 : vector<1x32xf32> to vector<8x32xf32>
    %143 = arith.addf %138, %142 : vector<8x32xf32>
    %144 = arith.addf %125, %143 : vector<8x32xf32>
    %c0_70 = arith.constant 0 : index
    %c0_71 = arith.constant 0 : index
    %145 = vector.load %arg17[%c0_70, %c0_71] : memref<1x32xf32, #tpu.memory_space<vmem>>, vector<1x32xf32>
    %146 = vector.shape_cast %145 : vector<1x32xf32> to vector<32xf32>
    %c0_72 = arith.constant 0 : index
    %c0_73 = arith.constant 0 : index
    %147 = vector.load %arg18[%c0_72, %c0_73] : memref<1x32xf32, #tpu.memory_space<vmem>>, vector<1x32xf32>
    %148 = vector.shape_cast %147 : vector<1x32xf32> to vector<32xf32>
    %cst_74 = arith.constant dense<0.000000e+00> : vector<8xf32>
    %149 = vector.multi_reduction <add>, %144, %cst_74 [1] : vector<8x32xf32> to vector<8xf32>
    %150 = vector.shape_cast %149 : vector<8xf32> to vector<8x1xf32>
    %cst_75 = arith.constant 3.200000e+01 : f32
    %151 = vector.broadcast %cst_75 : f32 to vector<8x1xf32>
    %152 = arith.divf %150, %151 : vector<8x1xf32>
    %153 = vector.broadcast %152 : vector<8x1xf32> to vector<8x32xf32>
    %154 = arith.subf %144, %153 : vector<8x32xf32>
    %155 = arith.mulf %154, %154 : vector<8x32xf32>
    %cst_76 = arith.constant dense<0.000000e+00> : vector<8xf32>
    %156 = vector.multi_reduction <add>, %155, %cst_76 [1] : vector<8x32xf32> to vector<8xf32>
    %157 = vector.shape_cast %156 : vector<8xf32> to vector<8x1xf32>
    %cst_77 = arith.constant 3.200000e+01 : f32
    %158 = vector.broadcast %cst_77 : f32 to vector<8x1xf32>
    %159 = arith.divf %157, %158 : vector<8x1xf32>
    %160 = vector.broadcast %152 : vector<8x1xf32> to vector<8x32xf32>
    %161 = arith.subf %144, %160 : vector<8x32xf32>
    %cst_78 = arith.constant 9.99999974E-6 : f32
    %162 = vector.broadcast %cst_78 : f32 to vector<8x1xf32>
    %163 = arith.addf %159, %162 : vector<8x1xf32>
    %164 = math.rsqrt %163 : vector<8x1xf32>
    %165 = vector.broadcast %164 : vector<8x1xf32> to vector<8x32xf32>
    %166 = arith.mulf %161, %165 : vector<8x32xf32>
    %167 = vector.shape_cast %146 : vector<32xf32> to vector<1x32xf32>
    %168 = vector.broadcast %167 : vector<1x32xf32> to vector<8x32xf32>
    %169 = arith.mulf %166, %168 : vector<8x32xf32>
    %170 = vector.shape_cast %148 : vector<32xf32> to vector<1x32xf32>
    %171 = vector.broadcast %170 : vector<1x32xf32> to vector<8x32xf32>
    %172 = arith.addf %169, %171 : vector<8x32xf32>
    %c0_79 = arith.constant 0 : index
    %c0_80 = arith.constant 0 : index
    %c0_81 = arith.constant 0 : index
    %173 = vector.load %arg19[%c0_79, %c0_80, %c0_81] : memref<1x8x32xf32, #tpu.memory_space<vmem>>, vector<1x8x32xf32>
    %174 = vector.shape_cast %173 : vector<1x8x32xf32> to vector<8x32xf32>
    %175 = vector.shape_cast %172 : vector<8x32xf32> to vector<1x8x32xf32>
    tpu.vector_store %arg19[%c0_79, %c0_80, %c0_81], %175 {strides = array<i32>} : memref<1x8x32xf32, #tpu.memory_space<vmem>>, vector<1x8x32xf32>,
    return
  }
  func.func @transform_0(%arg0: i32, %arg1: i32) -> (i32, i32, i32) {
    %c0_i32 = arith.constant 0 : i32
    %c0_i32_0 = arith.constant 0 : i32
    %c0_i32_1 = arith.constant 0 : i32
    return %arg0, %c0_i32, %c0_i32_0 : i32, i32, i32
  }
  func.func @transform_1(%arg0: i32, %arg1: i32) -> (i32, i32) {
    %c0_i32 = arith.constant 0 : i32
    %c0_i32_0 = arith.constant 0 : i32
    %c0_i32_1 = arith.constant 0 : i32
    return %c0_i32, %c0_i32_0 : i32, i32
  }
  func.func @transform_2(%arg0: i32, %arg1: i32) -> (i32, i32) {
    %c0_i32 = arith.constant 0 : i32
    %c0_i32_0 = arith.constant 0 : i32
    %c0_i32_1 = arith.constant 0 : i32
    return %c0_i32, %c0_i32_0 : i32, i32
  }
  func.func @transform_3(%arg0: i32, %arg1: i32) -> (i32, i32) {
    %c0_i32 = arith.constant 0 : i32
    %c0_i32_0 = arith.constant 0 : i32
    %c0_i32_1 = arith.constant 0 : i32
    return %c0_i32, %c0_i32_0 : i32, i32
  }
  func.func @transform_4(%arg0: i32, %arg1: i32) -> (i32, i32) {
    %c0_i32 = arith.constant 0 : i32
    %c0_i32_0 = arith.constant 0 : i32
    %c0_i32_1 = arith.constant 0 : i32
    return %c0_i32, %c0_i32_0 : i32, i32
  }
  func.func @transform_5(%arg0: i32, %arg1: i32) -> (i32, i32) {
    %c0_i32 = arith.constant 0 : i32
    %c0_i32_0 = arith.constant 0 : i32
    %c0_i32_1 = arith.constant 0 : i32
    return %c0_i32, %c0_i32_0 : i32, i32
  }
  func.func @transform_6(%arg0: i32, %arg1: i32) -> (i32, i32) {
    %c0_i32 = arith.constant 0 : i32
    %c0_i32_0 = arith.constant 0 : i32
    %c0_i32_1 = arith.constant 0 : i32
    return %c0_i32, %c0_i32_0 : i32, i32
  }
  func.func @transform_7(%arg0: i32, %arg1: i32) -> (i32, i32) {
    %c0_i32 = arith.constant 0 : i32
    %c0_i32_0 = arith.constant 0 : i32
    %c0_i32_1 = arith.constant 0 : i32
    return %c0_i32, %c0_i32_0 : i32, i32
  }
  func.func @transform_8(%arg0: i32, %arg1: i32) -> (i32, i32) {
    %c0_i32 = arith.constant 0 : i32
    %c0_i32_0 = arith.constant 0 : i32
    %c0_i32_1 = arith.constant 0 : i32
    return %c0_i32, %c0_i32_0 : i32, i32
  }
  func.func @transform_9(%arg0: i32, %arg1: i32) -> (i32, i32) {
    %c0_i32 = arith.constant 0 : i32
    %c0_i32_0 = arith.constant 0 : i32
    %c0_i32_1 = arith.constant 0 : i32
    return %c0_i32, %c0_i32_0 : i32, i32
  }
  func.func @transform_10(%arg0: i32, %arg1: i32) -> (i32, i32) {
    %c0_i32 = arith.constant 0 : i32
    %c0_i32_0 = arith.constant 0 : i32
    %c0_i32_1 = arith.constant 0 : i32
    return %c0_i32, %c0_i32_0 : i32, i32
  }
  func.func @transform_11(%arg0: i32, %arg1: i32) -> (i32, i32) {
    %c0_i32 = arith.constant 0 : i32
    %c0_i32_0 = arith.constant 0 : i32
    %c0_i32_1 = arith.constant 0 : i32
    return %c0_i32, %c0_i32_0 : i32, i32
  }
  func.func @transform_12(%arg0: i32, %arg1: i32) -> (i32, i32) {
    %c0_i32 = arith.constant 0 : i32
    %c0_i32_0 = arith.constant 0 : i32
    %c0_i32_1 = arith.constant 0 : i32
    return %c0_i32, %c0_i32_0 : i32, i32
  }
  func.func @transform_13(%arg0: i32, %arg1: i32) -> (i32, i32) {
    %c0_i32 = arith.constant 0 : i32
    %c0_i32_0 = arith.constant 0 : i32
    %c0_i32_1 = arith.constant 0 : i32
    return %c0_i32, %c0_i32_0 : i32, i32
  }
  func.func @transform_14(%arg0: i32, %arg1: i32) -> (i32, i32) {
    %c0_i32 = arith.constant 0 : i32
    %c0_i32_0 = arith.constant 0 : i32
    %c0_i32_1 = arith.constant 0 : i32
    return %c0_i32, %c0_i32_0 : i32, i32
  }
  func.func @transform_15(%arg0: i32, %arg1: i32) -> (i32, i32) {
    %c0_i32 = arith.constant 0 : i32
    %c0_i32_0 = arith.constant 0 : i32
    %c0_i32_1 = arith.constant 0 : i32
    return %c0_i32, %c0_i32_0 : i32, i32
  }
  func.func @transform_16(%arg0: i32, %arg1: i32) -> (i32, i32) {
    %c0_i32 = arith.constant 0 : i32
    %c0_i32_0 = arith.constant 0 : i32
    %c0_i32_1 = arith.constant 0 : i32
    return %c0_i32, %c0_i32_0 : i32, i32
  }
  func.func @transform_17(%arg0: i32, %arg1: i32) -> (i32, i32, i32) {
    %c0_i32 = arith.constant 0 : i32
    %c0_i32_0 = arith.constant 0 : i32
    return %arg0, %arg1, %c0_i32 : i32, i32, i32
  }
}

</mosaic_0001>

<bundles_post_ra>
// kernel: tpu_custom_call.1
= control target key start
LH: loop header
LB: loop body
LE: loop exit
PB: predicated region body
PF: predicated region fallthrough
CT: control target
= control target key end

     0   :  { %s2768_s0 = inlined_call_operand.vmem [shape: f32[2,8,32], index: 0, kind: input, shape index: {}]   ;;  %s2769_s1 = inlined_call_operand.vmem [shape: bf16[32,32], index: 1, kind: input, shape index: {}]   ;;  %s2770_s2 = inlined_call_operand.vmem [shape: f32[1,32], index: 2, kind: input, shape index: {}]   ;;  %s2771_s3 = inlined_call_operand.vmem [shape: bf16[32,32], index: 3, kind: input, shape index: {}]   ;;  %s2772_s4 = inlined_call_operand.vmem [shape: f32[1,32], index: 4, kind: input, shape index: {}]   ;;  %s2773_s5 = inlined_call_operand.hbm [shape: bf16[32,32], index: 5, kind: input, shape index: {}]   ;;  %s2774_s6 = inlined_call_operand.hbm [shape: f32[1,32], index: 6, kind: input, shape index: {}]   ;;  %s2775_s7 = inlined_call_operand.hbm [shape: bf16[32,32], index: 7, kind: input, shape index: {}]   ;;  %s2776_s8 = inlined_call_operand.hbm [shape: f32[1,32], index: 8, kind: input, shape index: {}]   ;;  %s2777_s9 = inlined_call_operand.vmem [shape: bf16[32,64], index: 9, kind: input, shape index: {}]   ;;  %s2778_s10 = inlined_call_operand.vmem [shape: f32[1,64], index: 10, kind: input, shape index: {}]   ;;  %s2779_s11 = inlined_call_operand.vmem [shape: bf16[64,32], index: 11, kind: input, shape index: {}]   ;;  %s2780_s12 = inlined_call_operand.vmem [shape: f32[1,32], index: 12, kind: input, shape index: {}]   ;;  %s2781_s13 = inlined_call_operand.vmem [shape: f32[1,32], index: 13, kind: input, shape index: {}]   ;;  %s2782_s14 = inlined_call_operand.vmem [shape: f32[1,32], index: 14, kind: input, shape index: {}]   ;;  %s2783_s15 = inlined_call_operand.vmem [shape: f32[1,32], index: 15, kind: input, shape index: {}]   ;;  %s2784_s16 = inlined_call_operand.vmem [shape: f32[1,32], index: 16, kind: input, shape index: {}]   ;;  %s2785_s17 = inlined_call_operand.hbm [shape: f32[2,8,32], index: 17, kind: output, shape index: {}]  }
   0x1   :  { %2802 = sst [smem:[#allocation27_spill]] %s2768_s0 }
   0x2   :  { %2803 = sst [smem:[#allocation28_spill]] %s2769_s1 }
   0x3   :  { %2804 = sst [smem:[#allocation29_spill]] %s2774_s6 }
   0x4   :  { %2805 = sst [smem:[#allocation30_spill]] %s2778_s10 }
   0x5   :  { %2806 = sst [smem:[#allocation31_spill]] %s2780_s12 }
   0x6   :  { %2807 = sst [smem:[#allocation32_spill]] %s2783_s15 }
   0x7   :  { %2808 = sst [smem:[#allocation33_spill]] %s2784_s16 }
   0x8   :  { %2809 = sst [smem:[#allocation34_spill]] %s2785_s17 }
   0x9   :  { %22 = vsyncpa [#allocation6], 0 }
   0xa   :  { %23 = vsyncpa [#allocation9], 0 }
   0xb   :  { %24 = vsyncpa [#allocation12], 0 }
   0xc   :  { %25 = vsyncpa [#allocation7], 0 }
   0xd   :  { %27 = vsyncpa [#allocation7 + $0x1], 0  ;;  %s2387_s24 = smov 0   ;;  %s2389_s25 = smov 0  }
   0xe   :  { %s2391_s26 = smov 0   ;;  %s2393_s27 = smov 0  }
   0xf   :  { %s2395_s28 = smov 0   ;;  %s2397_s29 = smov 0  }
  0x10 LB: > { %2810 = sst [smem:[#allocation18_spill]] %s2260_s24  ;;  %s1727_s0 = sadd.s32 4294967295, %s2280_s29   ;;  %s2280_s29 = sphi %s2397_s29, %s33_s29   ;;  %s2276_s28 = sphi %s2395_s28, %s2846_s28   ;;  %s2272_s27 = sphi %s2393_s27, %s2845_s27   ;;  %s2268_s26 = sphi %s2391_s26, %s2844_s26   ;;  %s2264_s25 = sphi %s2389_s25, %s2843_s25   ;;  %s2260_s24 = sphi %s2387_s24, %s2842_s24  }
  0x11   : > { %2811 = sst [smem:[#allocation19_spill]] %s2264_s25  ;;  %s1728_s30 = sadd.s32 4294967294, %s2280_s29  }
  0x12   : > { %2812 = sst [smem:[#allocation20_spill]] %s2268_s26  ;;  %s45_s18 = sadd.s32 1, %s2276_s28 }
  0x13   : > { %2813 = sst [smem:[#allocation21_spill]] %s2276_s28  ;;  %s416_s19 = sadd.s32 1, %s2268_s26 }
  0x14   : > { %2814 = sst [smem:[#allocation22_spill]] %s2280_s29  ;;  %p47_p0 = scmp.ge.s32.totalorder %s45_s18, 2 }
  0x15   : > { %p426_p1 = scmp.ne.s32.totalorder %s2268_s26, %s2264_s25  ;;  %p427_p2 = scmp.eq.s32.totalorder %s1727_s0, 1 }
  0x16   : > { %p432_p3 = scmp.ne.s32.totalorder %s2264_s25, %s2260_s24  ;;  %s2848_s18 = smov (%p47_p0, %s45_s18), 0 }
  0x17   : > { %2815 = sst [smem:[#allocation23_spill]] %s2848_s18  ;;  %p2427_p4 = por %p427_p2, %p426_p1 }
  0x18   : > { %p433_p5 = scmp.eq.s32.totalorder %s1728_s30, 1  ;;  %s411_s20 = ssub.s32 %s2276_s28, %s2848_s18 }
  0x19   : > { %s2816_s1 = scalar_select %p2427_p4, 1, 0 }
  0x1a   : > { %p1729_p6 = scmp.ge.s32.totalorder %s2280_s29, 1  ;;  %p414_p7 = scmp.eq.s32.totalorder %s411_s20, 0 }
  0x1b   : > { %2817 = sst [smem:[#allocation24_spill]] %s2816_s1  ;;  %p2434_p8 = por %p433_p5, %p432_p3 }
  0x1c   : > { %p440_p9 = scmp.lt.s32.totalorder %s2280_s29, 3  ;;  %p2446_p11 = scmp.eq.s32.totalorder %s1727_s0, 0 }
  0x1d   : > { %s2818_s21 = scalar_select %p2434_p8, 1, 0 }
  0x1e   : > { %s2440_s22 = scalar_select %p414_p7, %s2268_s26, %s416_s19  }
  0x1f   : > { %2819 = sst [smem:[#allocation25_spill]] %s2818_s21  ;;  %p2442_p10 = pnand %p1729_p6, %p440_p9 }
  0x20   : > { %2820 = sst [smem:[#allocation26_spill]] %s2440_s22  ;;  %s2282_s30 = smov [#allocation8]  }
  0x21   : > { %s2821_s23 = scalar_select %p2442_p10, 1, 0 }
  0x22   : > { %s2822_s24 = scalar_select %p2446_p11, 1, 0 }
  0x23   : > { %p1950_p12 = pneg %p2442_p10  ;;  %s478_s20 = sshll.u32 %s2282_s30, 4  ;;  %s479_s20 = int_to_ptr.vmem [resolvable:$true] %s478_s20 }
  0x24   : > { %s2283_s19 = smov [#allocation5]   ;;  %s2824_s6 = sld [smem:[#allocation29_spill]] }
  0x25   : > { %p2454_p13 = pnand %p2446_p11, %p1950_p12  ;;  %s464_s28 = sshll.u32 %s2283_s19, 4  ;;  %s2458_s28 = int_to_ptr.vmem [resolvable:$true] %s464_s28 }
  0x27   : > { %p2468_p1 = pneg %p2454_p13 }
  0x2a   : > { %s2078_s26 = scalar_lea.hbm %s2824_s6, 16 }
  0x2b   : > { %p2079_p0 = scmp.ne.s32.totalorder %s2824_s6, %s2078_s26  ;;  %p2085_p5 = scmp.lt.u32.totalorder %s2078_s26, %s2824_s6 }
  0x2d   : > { %p2081_p2 = pnand %p2468_p1, %p2079_p0 }
  0x2f   : > { %p2082_p3 = pneg %p2081_p2 }
  0x31   : > { %p2087_p6 = pnand %p2085_p5, %p2082_p3 }
  0x33   : > { %2090 = shalt.err (!%p2087_p6)
}
  0x34   : > { %s2091_s22 = scalar_lea.vmem %s479_s20, 16  ;;  %s2098_s29 = scalar_lea.vmem %s479_s20, 32 }
  0x35   : > { %p2092_p7 = scmp.ne.s32.totalorder %s479_s20, %s2091_s22  ;;  %p2099_p8 = scmp.lt.s32.totalorder %s479_s20, %s479_s20 }
  0x36   : > { %p2100_p4 = scmp.lt.s32.totalorder %s2098_s29, %s2091_s22 }
  0x37   : > { %p2094_p9 = pnand %p2092_p7, %p2468_p1 }
  0x38   : > { %p2101_p11 = por %p2100_p4, %p2099_p8 }
  0x39   : > { %p2095_p12 = pneg %p2094_p9 }
  0x3b   : > { %p2102_p10 = pnand %p2101_p11, %p2095_p12 }
  0x3d   : > { %2105 = shalt.err (!%p2102_p10)
}
  0x3e   : > { %1956 = dma.hbm_to_vmem [thread:$0]  (!%p2454_p13), %s2824_s6, 16, %s479_s20, [#allocation9]  }
  0x3f   : > { %s2106_s19 = scalar_lea.hbm %s2773_s5, 256 }
  0x40   : > { %p2107_p0 = scmp.ne.s32.totalorder %s2773_s5, %s2106_s19  ;;  %p2113_p8 = scmp.lt.u32.totalorder %s2106_s19, %s2773_s5 }
  0x42   : > { %p2109_p2 = pnand %p2107_p0, %p2468_p1 }
  0x44   : > { %p2110_p4 = pneg %p2109_p2 }
  0x46   : > { %p2115_p10 = pnand %p2113_p8, %p2110_p4 }
  0x48   : > { %2118 = shalt.err (!%p2115_p10)
}
  0x49   : > { %s2119_s20 = scalar_lea.vmem %s2458_s28, 256  ;;  %p2127_p6 = scmp.lt.s32.totalorder %s2458_s28, %s2458_s28 }
  0x4a   : > { %p2120_p11 = scmp.ne.s32.totalorder %s2458_s28, %s2119_s20  ;;  %p2128_p7 = scmp.lt.s32.totalorder %s2119_s20, %s2119_s20 }
  0x4c   : > { %p2122_p3 = pnand %p2120_p11, %p2468_p1  ;;  %p2129_p9 = por %p2128_p7, %p2127_p6 }
  0x4e   : > { %p2123_p5 = pneg %p2122_p3 }
  0x50   : > { %p2130_p12 = pnand %p2129_p9, %p2123_p5 }
  0x52   : > { %2133 = shalt.err (!%p2130_p12)
}
  0x53   : > { %s2284_s15 = smov 64   ;;  %s2285_s16 = smov 4  }
  0x54   : > { %1953 = dma.hbm_to_vmem [thread:$0]  (!%p2454_p13), %s2773_s5, 256, %s2458_s28, [#allocation6], %s2284_s15, %s2284_s15, %s2285_s16  }
  0x55   : > { %s2286_s17 = smov [#allocation10]   ;;  %s2287_s19 = smov [#allocation11]  }
  0x56   : > { %s488_s26 = sshll.u32 %s2286_s17, 4  ;;  %s502_s22 = sshll.u32 %s2287_s19, 4  ;;  %s489_s26 = int_to_ptr.vmem [resolvable:$true] %s488_s26  ;;  %s503_s22 = int_to_ptr.vmem [resolvable:$true] %s502_s22 }
  0x57   : > { %s2134_s6 = scalar_lea.hbm %s2775_s7, 256 }
  0x58   : > { %p2135_p0 = scmp.ne.s32.totalorder %s2775_s7, %s2134_s6  ;;  %p2141_p8 = scmp.lt.u32.totalorder %s2134_s6, %s2775_s7 }
  0x5a   : > { %p2137_p2 = pnand %p2135_p0, %p2468_p1 }
  0x5c   : > { %p2138_p4 = pneg %p2137_p2 }
  0x5e   : > { %p2143_p10 = pnand %p2141_p8, %p2138_p4 }
  0x60   : > { %2146 = shalt.err (!%p2143_p10)
}
  0x61   : > { %s2147_s28 = scalar_lea.vmem %s489_s26, 256  ;;  %p2155_p6 = scmp.lt.s32.totalorder %s489_s26, %s489_s26 }
  0x62   : > { %p2148_p11 = scmp.ne.s32.totalorder %s489_s26, %s2147_s28  ;;  %p2156_p7 = scmp.lt.s32.totalorder %s2147_s28, %s2147_s28 }
  0x64   : > { %p2150_p3 = pnand %p2148_p11, %p2468_p1  ;;  %p2157_p9 = por %p2156_p7, %p2155_p6 }
  0x66   : > { %p2151_p5 = pneg %p2150_p3 }
  0x68   : > { %p2158_p12 = pnand %p2157_p9, %p2151_p5 }
  0x6a   : > { %2161 = shalt.err (!%p2158_p12)
}
  0x6b   : > { %1959 = dma.hbm_to_vmem [thread:$0]  (!%p2454_p13), %s2775_s7, 256, %s489_s26, [#allocation9], %s2284_s15, %s2284_s15, %s2285_s16  }
  0x6c   : > { %s2162_s12 = scalar_lea.hbm %s2776_s8, 16 }
  0x6d   : > { %p2163_p0 = scmp.ne.s32.totalorder %s2776_s8, %s2162_s12  ;;  %p2169_p8 = scmp.lt.u32.totalorder %s2162_s12, %s2776_s8 }
  0x6f   : > { %p2165_p2 = pnand %p2163_p0, %p2468_p1 }
  0x71   : > { %p2166_p4 = pneg %p2165_p2 }
  0x73   : > { %p2171_p10 = pnand %p2169_p8, %p2166_p4 }
  0x75   : > { %2174 = shalt.err (!%p2171_p10)
}
  0x76   : > { %s2175_s29 = scalar_lea.vmem %s503_s22, 16  ;;  %s2182_s15 = scalar_lea.vmem %s503_s22, 32 }
  0x77   : > { %p2176_p11 = scmp.ne.s32.totalorder %s503_s22, %s2175_s29  ;;  %p2183_p6 = scmp.lt.s32.totalorder %s503_s22, %s503_s22 }
  0x78   : > { %p2184_p7 = scmp.lt.s32.totalorder %s2182_s15, %s2175_s29 }
  0x79   : > { %p2178_p3 = pnand %p2176_p11, %p2468_p1 }
  0x7a   : > { %p2185_p9 = por %p2184_p7, %p2183_p6 }
  0x7b   : > { %p2179_p5 = pneg %p2178_p3 }
  0x7d   : > { %p2186_p12 = pnand %p2185_p9, %p2179_p5 }
  0x7f   : > { %2189 = shalt.err (!%p2186_p12)
}
  0x80   : > { %1962 = dma.hbm_to_vmem [thread:$0]  (!%p2454_p13), %s2776_s8, 16, %s503_s22, [#allocation12]  }
  0x81   : > { %p2826_p0 = scmp.ne.s32.totalorder %s2821_s23, 0 }
  0x82   : > { %p2827_p2 = scmp.ne.s32.totalorder (!%p2826_p0), %s2822_s24, 0 }
  0x83   : > { %546 = sbr.rel (%p2826_p0) target bundleno = 2521 (0x9d9), region = 88 }
  0x8a   : > { %2243 = dma.done.wait (%p2827_p2), [#allocation6], 256  }
  0x8b   : > { %2245 = vsyncadd (%p2827_p2), [#allocation6], 4294967040 }
  0x8c   : > { %2247 = dma.done.wait (%p2827_p2), [#allocation9], 272  }
  0x8d   : > { %2249 = vsyncadd (%p2827_p2), [#allocation9], 4294967024 }
  0x8e   : > { %2251 = dma.done.wait (%p2827_p2), [#allocation12], 16  }
  0x8f   : > { %2253 = vsyncadd (%p2827_p2), [#allocation12], 4294967280  ;;  %p609_p13 = scmp.lt.s32.totalorder %s2272_s27, 1  ;;  %v2288_v0 = vmov 0.0   ;;  %vm2289_vm0 = vmmov 0   ;;  %s2828_s22 = sld [smem:[#allocation27_spill]] }
  0x90   : > { %1832 = vmatprep.subr.bf16.mxu0 %v2288_v0  ;;  %1836 = vmatprep.mubr.msk.bf16.mxu0 %vm2289_vm0, %v2288_v0  ;;  %v2038_v1 = vld [vmem:[%s2771_s3] sm:$0xff]   ;;  %v2039_v2 = vld [vmem:[%s2771_s3 + $0x8] sm:$0xff]   ;;  %vm643_vm1 = vcmask 261120   ;;  %s2829_s21 = sld [smem:[#allocation28_spill]]  ;;  %v2043_v8 = vld [vmem:[#allocation5 + $0x8] sm:$0xff]   ;;  %vm688_vm2 = vcmask 257024  }
  0x91   : > { %s610_s18 = scalar_select %p609_p13, %s2272_s27, 1  ;;  %1840 = vmatprep.subr.bf16.mxu1 %v2288_v0  ;;  %1844 = vmatprep.mubr.msk.bf16.mxu1 %vm2289_vm0, %v2288_v0  ;;  %v2042_v7 = vld [vmem:[#allocation5] sm:$0xff]   ;;  %v1742_v9 = vld [vmem:[%s2772_s4] ss:$0 sm:$0xff]  ;;  %vm828_vm3 = vcmask 64512   ;;  %vm890_vm4 = vcmask 1043456  }
  0x92   : > { %1833 = vmatpush3.bf16.msra.mxu0 %v2038_v1  ;;  %1841 = vmatpush3.bf16.msra.mxu1 %v2042_v7  ;;  %v1750_v16 = vld [vmem:[%s2770_s2] ss:$0 sm:$0xff]  ;;  %s2290_s26 = smov 112   ;;  %v1746_v28 = vld [vmem:[#allocation8] ss:$0 sm:$0xff]  ;;  %vm936_vm5 = vcmask 60416  }
  0x93   : > { %s1741_s23 = sshll.u32 %s610_s18, 3  ;;  %1834 = vmatprep.subr.bf16.mxu0 %v2288_v0  ;;  %1842 = vmatprep.subr.bf16.mxu1 %v2288_v0  ;;  %s2291_s18 = smov 120   ;;  %vm1064_vm6 = vcmask 126016   ;;  %vm1191_vm7 = vcmask 191616   ;;  %vm1318_vm8 = vcmask 257216   ;;  %vm1526_vm9 = vcmask 523264  }
  0x94   : > { %s2293_s30 = smov 8   ;;  %s2294_s24 = smov 16  }
  0x95   : > { %s612_s20 = scalar_lea.vmem %s2828_s22, %s1741_s23  ;;  %s2292_s23 = smov 104  }
  0x96   : > { %v2574_v3 = vld [vmem:[%s612_s20] sm:$0xff]  ;;  %1835 = vmatpush3.bf16.msra.mxu0 %v2039_v2  ;;  %v2041_v6 = vld [vmem:[%s2829_s21 + $0x8] sm:$0xff]   ;;  %1843 = vmatpush3.bf16.msra.mxu1 %v2043_v8  ;;  %s2295_s22 = smov 24   ;;  %s2831_s25 = sld [smem:[#allocation31_spill]] }
  0x97   : > { %v2040_v4 = vld [vmem:[%s2829_s21] sm:$0xff]   ;;  %v619_v5 = vpack.c.bf16 %v2574_v3, %v2574_v3  ;;  %1848 = vmatprep.subr.bf16.mxu0 %v2288_v0  ;;  %1856 = vmatprep.subr.bf16.mxu1 %v2288_v0  ;;  %s2832_s1 = sld [smem:[#allocation19_spill]]  ;;  %s2833_s12 = sld [smem:[#allocation24_spill]] }
  0x98   : > { %s2834_s19 = sld [smem:[#allocation32_spill]]  ;;  %s2835_s16 = sld [smem:[#allocation33_spill]] }
  0x99   : > { %1837 = vmatmul.mubr.msk.bf16.vlgmr.msra.gmra.mrb[0].mxu0 %vm643_vm1, %v619_v5  ;;  %1845 = vmatmul.mubr.msk.bf16.vlgmr.msra.gmra.mrb[0].mxu1 %vm643_vm1, %v619_v5 }
  0x9a   : > { %1849 = vmatpush3.bf16.msra.mxu0 %v2040_v4  ;;  %1852 = vmatprep.mubr.msk.bf16.mxu0 %vm2289_vm0, %v2288_v0 }
  0x9b   : > { %1850 = vmatprep.subr.bf16.mxu0 %v2288_v0  ;;  %1858 = vmatprep.mubr.msk.bf16.mxu1 %vm2289_vm0, %v2288_v0 }
  0x9d   : > { %s606_s6 = sand.u32 1, %s2832_s1   ;;  %p2837_p4 = scmp.ne.s32.totalorder %s2833_s12, 0 }
  0x9e   : > { %1851 = vmatpush3.bf16.msra.mxu0 %v2041_v6  ;;  %s1740_s10 = sshll.u32 %s606_s6, 3  ;;  %s1602_s28 = scalar_lea.sflag [#allocation7], %s606_s6 }
  0x9f   : > { %1862 = vmatprep.subr.bf16.mxu0 %v2288_v0 }
  0xa1   : > { %1853 = vmatmul.mubr.msk.bf16.vlgmr.msra.gmra.mrb[4].mxu0 %vm643_vm1, %v619_v5 }
  0xa2   : > { %1864 = vmatprep.mubr.msk.bf16.mxu0 %vm2289_vm0, %v2288_v0 }
 0x16c   : > { %v681_v10 = vpop.f32.mrb[0].mxu0  ;;  %v747_v29 = vpop.f32.mrb[0].mxu1 }
 0x16d   : > { %v682_v11 = vadd.f32 %v1742_v9, %v681_v10  ;;  %v1838_v12 = vpop.f32.mrb[1].mxu0  ;;  %v748_v30 = vadd.f32 %v1746_v28, %v747_v29  ;;  %v1846_v31 = vpop.f32.mrb[1].mxu1 }
 0x16e   : > { %v684_v13 = vpop.f32.mrb[2].mxu0  ;;  %v750_v32 = vpop.f32.mrb[2].mxu1 }
 0x16f   : > { %v687_v14 = vpack.c.bf16 %v682_v11, %v682_v11  ;;  %v1839_v15 = vpop.f32.mrb[3].mxu0  ;;  %v753_v33 = vpack.c.bf16 %v748_v30, %v748_v30  ;;  %v1847_v34 = vpop.f32.mrb[3].mxu1 }
 0x171   : > { %689 = vst.msk [vmem:[#allocation2] sm:$0xf] %vm688_vm2, %v687_v14  ;;  %754 = vst.msk [vmem:[#allocation3] sm:$0xf] %vm688_vm2, %v753_v33 }
 0x174   : > { %v820_v17 = vpop.f32.mrb[4].mxu0 }
 0x175   : > { %v1854_v18 = vpop.f32.mrb[5].mxu0  ;;  %v821_v19 = vadd.f32 %v1750_v16, %v820_v17 }
 0x176   : > { %v823_v20 = vpop.f32.mrb[6].mxu0 }
 0x177   : > { %v1855_v21 = vpop.f32.mrb[7].mxu0  ;;  %v826_v26 = vpack.c.bf16 %v821_v19, %v821_v19 }
 0x178   : > { %v827_v22 = vld [vmem:[#allocation2] sm:$0xf]  ;;  %v886_v35 = vld [vmem:[#allocation3] sm:$0xf] }
 0x179   : > { %v2044_v23 = vld [vmem:[#allocation2] ss:$0 sps:$4 sm:$0xff]   ;;  %v833_v24 = vsel %vm828_vm3, %v827_v22, 0  ;;  %v892_v36 = vsel %vm890_vm4, %v886_v35, 0  ;;  %v2047_v1 = vld [vmem:[#allocation3] ss:$0 sps:$4 sm:$0xff]  }
 0x17a   : > { %v2045_v25 = vld [vmem:[#allocation2] ss:$0 sps:$4 sm:$0xff]   ;;  %1857 = vmatpush3.bf16.xpose.msra.mxu1 %v833_v24  ;;  %1072 = vrot.lane.b32.xlu1 %v2044_v23, %s2290_s26  ;;  %v2048_v5 = vld [vmem:[#allocation3] ss:$0 sps:$4 sm:$0xff]  }
 0x17b   : > { %945 = vrot.lane.b32.xlu0 %v2045_v25, %s2291_s18  ;;  %1868 = vmatprep.subr.bf16.mxu1 %v2288_v0  ;;  %v2046_v27 = vld [vmem:[#allocation2] ss:$0 sps:$4 sm:$0xff]   ;;  %v2049_v9 = vld [vmem:[#allocation3] ss:$0 sps:$4 sm:$0xff]  }
 0x17c   : > { %1863 = vmatpush3.bf16.msra.mxu0 %v892_v36 }
 0x17d   : > { %1874 = vmatprep.subr.bf16.mxu0 %v2288_v0 }
 0x17e   : > { %1067 = vrot.lane.b32.xlu1 %v826_v26, %s2290_s26 }
 0x17f   : > { %940 = vrot.lane.b32.xlu0 %v826_v26, %s2291_s18 }
 0x181   : > { %1859 = vmatmul.mubr.msk.bf16.vlgmr.msra.gmra.mrb[4].mxu1 %vm828_vm3, %v826_v26 }
 0x182   : > { %1194 = vrot.lane.b32.xlu1 %v826_v26, %s2292_s23  ;;  %1870 = vmatprep.mubr.msk.bf16.mxu1 %vm2289_vm0, %v2288_v0 }
 0x183   : > { %1199 = vrot.lane.b32.xlu0 %v2046_v27, %s2292_s23 }
 0x1ec   : > { %v1073_v39 = vpop.permute.xlu1 %1072 }
 0x1ed   : > { %v946_v37 = vpop.permute.xlu0 %945  ;;  %v1078_v41 = vsel %vm828_vm3, %v1073_v39, 0 }
 0x1ee   : > { %v951_v38 = vsel %vm828_vm3, %v946_v37, 0 }
 0x1ef   : > { %1869 = vmatpush3.bf16.xpose.msra.mxu1 %v951_v38 }
 0x1f0   : > { %1880 = vmatprep.subr.bf16.mxu1 %v2288_v0  ;;  %v1068_v43 = vpop.permute.xlu1 %1067 }
 0x1f1   : > { %v941_v40 = vpop.permute.xlu0 %940 }
 0x1f4   : > { %v1195_v45 = vpop.permute.xlu1 %1194 }
 0x1f5   : > { %v1200_v42 = vpop.permute.xlu0 %1199 }
 0x1f6   : > { %1871 = vmatmul.mubr.msk.bf16.vlgmr.msra.gmra.mrb[8].mxu1 %vm828_vm3, %v941_v40  ;;  %v1205_v44 = vsel %vm828_vm3, %v1200_v42, 0 }
 0x1f7   : > { %1881 = vmatpush3.bf16.xpose.msra.mxu1 %v1078_v41  ;;  %1882 = vmatprep.mubr.msk.bf16.mxu1 %vm2289_vm0, %v2288_v0 }
 0x1f8   : > { %1892 = vmatprep.subr.bf16.mxu1 %v2288_v0 }
 0x1fe   : > { %1883 = vmatmul.mubr.msk.bf16.vlgmr.msra.gmra.mrb[12].mxu1 %vm828_vm3, %v1068_v43 }
 0x1ff   : > { %1893 = vmatpush3.bf16.xpose.msra.mxu1 %v1205_v44  ;;  %1894 = vmatprep.mubr.msk.bf16.mxu1 %vm2289_vm0, %v2288_v0 }
 0x200   : > { %1904 = vmatprep.subr.bf16.mxu1 %v2288_v0 }
 0x206   : > { %1895 = vmatmul.mubr.msk.bf16.vlgmr.msra.gmra.mrb[16].mxu1 %vm828_vm3, %v1195_v45 }
 0x207   : > { %1908 = vmatprep.mubr.msk.bf16.mxu1 %vm2289_vm0, %v2288_v0 }
 0x254   : > { %v869_v46 = vpop.f32.mrb[4].mxu1 }
 0x255   : > { %v1860_v47 = vpop.f32.mrb[5].mxu1  ;;  %v875_v48 = vsel %vm828_vm3, %v869_v46, -inf }
 0x256   : > { %876 = vmax.xlane.f32.xlu0 %v875_v48  ;;  %v872_v49 = vpop.f32.mrb[6].mxu1 }
 0x257   : > { %v1861_v50 = vpop.f32.mrb[7].mxu1 }
 0x2c9   : > { %v987_v51 = vpop.f32.mrb[8].mxu1 }
 0x2ca   : > { %v1872_v52 = vpop.f32.mrb[9].mxu1  ;;  %v993_v53 = vsel %vm828_vm3, %v987_v51, -inf }
 0x2cb   : > { %994 = vmax.xlane.f32.xlu1 %v993_v53  ;;  %v990_v54 = vpop.f32.mrb[10].mxu1 }
 0x2cc   : > { %v1873_v55 = vpop.f32.mrb[11].mxu1 }
 0x2d1   : > { %v1114_v56 = vpop.f32.mrb[12].mxu1 }
 0x2d2   : > { %v1884_v57 = vpop.f32.mrb[13].mxu1  ;;  %v1120_v58 = vsel %vm828_vm3, %v1114_v56, -inf }
 0x2d3   : > { %1121 = vmax.xlane.f32.xlu0 %v1120_v58  ;;  %v1117_v59 = vpop.f32.mrb[14].mxu1  ;;  %v2050_v57 = vld [vmem:[#allocation10] sm:$0xff]  }
 0x2d4   : > { %v1885_v60 = vpop.f32.mrb[15].mxu1  ;;  %1905 = vmatpush3.bf16.msra.mxu1 %v2050_v57 }
 0x2d5   : > { %1906 = vmatprep.subr.bf16.mxu1 %v2288_v0 }
 0x2d9   : > { %v1241_v61 = vpop.f32.mrb[16].mxu1 }
 0x2da   : > { %v1896_v62 = vpop.f32.mrb[17].mxu1  ;;  %v1247_v63 = vsel %vm828_vm3, %v1241_v61, -inf }
 0x2db   : > { %1248 = vmax.xlane.f32.xlu0 %v1247_v63  ;;  %v1244_v2 = vpop.f32.mrb[18].mxu1 }
 0x2dc   : > { %1008 = vrot.lane.b32.xlu1 %v2047_v1, %s2291_s18  ;;  %v1897_v4 = vpop.f32.mrb[19].mxu1  ;;  %s608_s18 = scalar_lea.vmem [#allocation13], %s1740_s10 }
 0x2e0   : > { %1262 = vrot.lane.b32.xlu1 %v2048_v5, %s2292_s23  ;;  %s1616_s23 = sshll.u32 %s608_s18, 4  ;;  %s2722_s23 = int_to_ptr.vmem [resolvable:$true] %s1616_s23 }
 0x2e3   : > { %v877_v6 = vpop.xlane.xlu0 %876 }
 0x2e4   : > { %v878_v7 = vsub.f32 %v869_v46, %v877_v6 }
 0x2e6   : > { %v879_v8 = vmul.f32 1.442695, %v878_v7 }
 0x2e8   : > { %2058 = vpow2.f32 %v879_v8 }
 0x2f1   : > { %1135 = vrot.lane.b32.xlu0 %v2049_v9, %s2290_s26  ;;  %s1790_s26 = sshll.u32 %s2272_s27, 7  ;;  %s2296_s27 = smov [#allocation13]  }
 0x2f2   : > { %v2059_v10 = vpop.eup %2058  ;;  %s2194_s1 = sshll.u32 %s2296_s27, 4  ;;  %s2195_s1 = int_to_ptr.vmem [resolvable:$false] %s2194_s1 }
 0x2f3   : > { %v884_v11 = vpack.c.bf16 %v2059_v10, %v2059_v10  ;;  %v881_v27 = vsel %vm828_vm3, %v2059_v10, 0.0  ;;  %s2196_s10 = scalar_lea.vmem %s2195_s1, 256  ;;  %p2197_p11 = scmp.lt.s32.totalorder %s2722_s23, %s2195_s1 }
 0x2f5   : > { %1865 = vmatmul.mubr.msk.bf16.vlgmr.msra.gmra.mrb[8].mxu0 %vm828_vm3, %v884_v11 }
 0x2f6   : > { %1876 = vmatprep.mubr.msk.bf16.mxu0 %vm2289_vm0, %v2288_v0 }
 0x358   : > { %v995_v12 = vpop.xlane.xlu1 %994 }
 0x359   : > { %v996_v13 = vsub.f32 %v987_v51, %v995_v12 }
 0x35b   : > { %v997_v14 = vmul.f32 1.442695, %v996_v13  ;;  %v1771_v13 = vld [vmem:[#allocation11] ss:$0 sm:$0xff] }
 0x35c   : > { %v1009_v15 = vpop.permute.xlu1 %1008 }
 0x35d   : > { %2060 = vpow2.f32 %v997_v14  ;;  %v1014_v16 = vsel %vm890_vm4, %v1009_v15, 0 }
 0x35e   : > { %1875 = vmatpush3.bf16.msra.mxu0 %v1014_v16 }
 0x35f   : > { %1886 = vmatprep.subr.bf16.mxu0 %v2288_v0 }
 0x360   : > { %v1122_v17 = vpop.xlane.xlu0 %1121  ;;  %v1263_v30 = vpop.permute.xlu1 %1262 }
 0x361   : > { %v1123_v18 = vsub.f32 %v1114_v56, %v1122_v17  ;;  %v1268_v33 = vsel %vm890_vm4, %v1263_v30, 0 }
 0x363   : > { %v1124_v19 = vmul.f32 1.442695, %v1123_v18 }
 0x365   : > { %2062 = vpow2.f32 %v1124_v19 }
 0x367   : > { %v2061_v20 = vpop.eup %2060 }
 0x368   : > { %v1249_v21 = vpop.xlane.xlu0 %1248  ;;  %v999_v22 = vsel %vm828_vm3, %v2061_v20, 0.0  ;;  %v1002_v23 = vpack.c.bf16 %v2061_v20, %v2061_v20 }
 0x369   : > { %v1250_v24 = vsub.f32 %v1241_v61, %v1249_v21  ;;  %1000 = vadd.xlane.f32.xlu1 %v999_v22  ;;  %v2051_v61 = vld [vmem:[#allocation10 + $0x8] sm:$0xff]  }
 0x36a   : > { %1877 = vmatmul.mubr.msk.bf16.vlgmr.msra.gmra.mrb[12].mxu0 %vm828_vm3, %v1002_v23  ;;  %1907 = vmatpush3.bf16.msra.mxu1 %v2051_v61 }
 0x36b   : > { %v1251_v25 = vmul.f32 1.442695, %v1250_v24  ;;  %1888 = vmatprep.mubr.msk.bf16.mxu0 %vm2289_vm0, %v2288_v0  ;;  %1920 = vmatprep.subr.bf16.mxu1 %v2288_v0 }
 0x36c   : > { %v1136_v26 = vpop.permute.xlu0 %1135 }
 0x36d   : > { %2064 = vpow2.f32 %v1251_v25  ;;  %v1141_v28 = vsel %vm890_vm4, %v1136_v26, 0  ;;  %882 = vadd.xlane.f32.xlu1 %v881_v27  ;;  %v2052_v26 = vld [vmem:[%s2777_s9] sm:$0xff]   ;;  %v2053_v27 = vld [vmem:[%s2777_s9 + $0x8] sm:$0xff]  }
 0x36e   : > { %1887 = vmatpush3.bf16.msra.mxu0 %v1141_v28  ;;  %v2055_v28 = vld [vmem:[%s2779_s11 + $0x8] sm:$0xff]  }
 0x36f   : > { %v2063_v29 = vpop.eup %2062  ;;  %1898 = vmatprep.subr.bf16.mxu0 %v2288_v0 }
 0x370   : > { %v1126_v31 = vsel %vm828_vm3, %v2063_v29, 0.0  ;;  %v1129_v32 = vpack.c.bf16 %v2063_v29, %v2063_v29 }
 0x371   : > { %1127 = vadd.xlane.f32.xlu0 %v1126_v31 }
 0x372   : > { %1889 = vmatmul.mubr.msk.bf16.vlgmr.msra.gmra.mrb[16].mxu0 %vm828_vm3, %v1129_v32 }
 0x373   : > { %1899 = vmatpush3.bf16.msra.mxu0 %v1268_v33  ;;  %1900 = vmatprep.mubr.msk.bf16.mxu0 %vm2289_vm0, %v2288_v0  ;;  %v1775_v33 = vld [vmem:[%s2781_s13] ss:$0 sm:$0xff] }
 0x374   : > { %1912 = vmatprep.subr.bf16.mxu0 %v2288_v0 }
 0x377   : > { %v2065_v34 = vpop.eup %2064 }
 0x378   : > { %v1253_v35 = vsel %vm828_vm3, %v2065_v34, 0.0  ;;  %v1256_v36 = vpack.c.bf16 %v2065_v34, %v2065_v34 }
 0x379   : > { %1254 = vadd.xlane.f32.xlu0 %v1253_v35  ;;  %v1776_v35 = vld [vmem:[%s2782_s14] ss:$0 sm:$0xff] }
 0x37a   : > { %1901 = vmatmul.mubr.msk.bf16.vlgmr.msra.gmra.mrb[20].mxu0 %vm828_vm3, %v1256_v36 }
 0x37b   : > { %1916 = vmatprep.mubr.msk.bf16.mxu0 %vm2289_vm0, %v2288_v0  ;;  %1913 = vmatpush3.bf16.msra.mxu0 %v2052_v26 }
 0x37c   : > { %1914 = vmatprep.subr.bf16.mxu0 %v2288_v0 }
 0x37f   : > { %1915 = vmatpush3.bf16.msra.mxu0 %v2053_v27 }
 0x3c8   : > { %v928_v37 = vpop.f32.mrb[8].mxu0 }
 0x3c9   : > { %v1866_v38 = vpop.f32.mrb[9].mxu0 }
 0x3ca   : > { %v931_v39 = vpop.f32.mrb[10].mxu0 }
 0x3cb   : > { %v1867_v40 = vpop.f32.mrb[11].mxu0  ;;  %v2056_v39 = vld [vmem:[%s2779_s11 + $0x10] sm:$0xff]  }
 0x3cc   : > { %v2057_v40 = vld [vmem:[%s2779_s11 + $0x18] sm:$0xff]  }
 0x3f6   : > { %v1001_v41 = vpop.xlane.xlu1 %1000 }
 0x3fa   : > { %v883_v42 = vpop.xlane.xlu1 %882 }
 0x3fb   : > { %2066 = vrcp.f32 %v883_v42 }
 0x3fc   : > { %2068 = vrcp.f32 %v1001_v41 }
 0x3fe   : > { %v1128_v46 = vpop.xlane.xlu0 %1127 }
 0x3ff   : > { %2070 = vrcp.f32 %v1128_v46 }
 0x405   : > { %v2067_v43 = vpop.eup %2066 }
 0x406   : > { %v934_v44 = vmul.f32 %v2067_v43, %v928_v37  ;;  %v2069_v47 = vpop.eup %2068  ;;  %v1255_v52 = vpop.xlane.xlu0 %1254 }
 0x407   : > { %2072 = vrcp.f32 %v1255_v52 }
 0x408   : > { %v935_v45 = vpack.c.bf16 %v934_v44, %v934_v44 }
 0x409   : > { %v2071_v55 = vpop.eup %2070 }
 0x40a   : > { %937 = vst.msk [vmem:[#allocation4] sm:$0xf] %vm936_vm5, %v935_v45 }
 0x411   : > { %v2073_v1 = vpop.eup %2072 }
 0x43d   : > { %v1050_v48 = vpop.f32.mrb[12].mxu0 }
 0x43e   : > { %v1056_v49 = vmul.f32 %v2069_v47, %v1050_v48  ;;  %v1878_v50 = vpop.f32.mrb[13].mxu0 }
 0x43f   : > { %v1053_v51 = vpop.f32.mrb[14].mxu0 }
 0x440   : > { %v1793_v53 = vpack.c.bf16 %v1056_v49, %v1056_v49  ;;  %v1879_v54 = vpop.f32.mrb[15].mxu0 }
 0x442   : > { %1061 = vrot.lane.b32.xlu0 %v1793_v53, %s2293_s30 }
 0x445   : > { %v1177_v56 = vpop.f32.mrb[16].mxu0 }
 0x446   : > { %v1183_v58 = vmul.f32 %v2071_v55, %v1177_v56  ;;  %v1890_v59 = vpop.f32.mrb[17].mxu0 }
 0x447   : > { %v1180_v60 = vpop.f32.mrb[18].mxu0 }
 0x448   : > { %v1794_v62 = vpack.c.bf16 %v1183_v58, %v1183_v58  ;;  %v1891_v63 = vpop.f32.mrb[19].mxu0 }
 0x44a   : > { %1188 = vrot.lane.b32.xlu1 %v1794_v62, %s2294_s24 }
 0x44d   : > { %v1304_v2 = vpop.f32.mrb[20].mxu0 }
 0x44e   : > { %v1310_v4 = vmul.f32 %v2073_v1, %v1304_v2  ;;  %v1902_v5 = vpop.f32.mrb[21].mxu0  ;;  %v1787_v2 = vld [vmem:[%s2834_s19] ss:$0 sm:$0xff] }
 0x44f   : > { %v1307_v6 = vpop.f32.mrb[22].mxu0  ;;  %v1788_v5 = vld [vmem:[%s2835_s16] ss:$0 sm:$0xff] }
 0x450   : > { %v1795_v7 = vpack.c.bf16 %v1310_v4, %v1310_v4  ;;  %v1903_v8 = vpop.f32.mrb[23].mxu0 }
 0x452   : > { %1315 = vrot.lane.b32.xlu1 %v1795_v7, %s2295_s22  ;;  %s2830_s22 = sld [smem:[#allocation30_spill]] }
 0x458   : > { %v1777_v41 = vld [vmem:[%s2830_s22] ss:$0 sm:$0xff]  ;;  %s2836_s22 = sld [smem:[#allocation34_spill]] }
 0x45e   : > { %s2720_s20 = scalar_lea.hbm %s2836_s22, %s1790_s26 }
 0x4b4   : > { %v1062_v9 = vpop.permute.xlu0 %1061 }
 0x4b5   : > { %1065 = vst.msk [vmem:[#allocation4] sm:$0xf] %vm1064_vm6, %v1062_v9 }
 0x4bc   : > { %v1189_v10 = vpop.permute.xlu1 %1188 }
 0x4bd   : > { %1192 = vst.msk [vmem:[#allocation4] sm:$0xf] %vm1191_vm7, %v1189_v10 }
 0x4c4   : > { %v1316_v11 = vpop.permute.xlu1 %1315 }
 0x4c5   : > { %1319 = vst.msk [vmem:[#allocation4] sm:$0xf] %vm1318_vm8, %v1316_v11 }
 0x4cc   : > { %v1320_v12 = vld [vmem:[#allocation4] sm:$0xf] }
 0x4cd   : > { %1909 = vmatmul.mubr.msk.bf16.vlgmr.msra.gmra.mrb[20].mxu1 %vm643_vm1, %v1320_v12 }
 0x4ce   : > { %1928 = vmatprep.mubr.msk.bf16.mxu1 %vm2289_vm0, %v2288_v0 }
 0x5a0   : > { %v1381_v14 = vpop.f32.mrb[20].mxu1 }
 0x5a1   : > { %v1382_v15 = vadd.f32 %v1771_v13, %v1381_v14  ;;  %v1910_v16 = vpop.f32.mrb[21].mxu1 }
 0x5a2   : > { %v1384_v17 = vpop.f32.mrb[22].mxu1 }
 0x5a3   : > { %v1911_v18 = vpop.f32.mrb[23].mxu1  ;;  %v1387_v19 = vadd.f32 %v1382_v15, %v2574_v3  ;;  %v2054_v3 = vld [vmem:[%s2779_s11] sm:$0xff]  }
 0x5a4   : > { %1921 = vmatpush3.bf16.msra.mxu1 %v2054_v3 }
 0x5a5   : > { %v1390_v20 = vsel %vm643_vm1, %v1387_v19, 0.0  ;;  %1922 = vmatprep.subr.bf16.mxu1 %v2288_v0 }
 0x5a6   : > { %1391 = vadd.xlane.f32.xlu0 %v1390_v20 }
 0x5a8   : > { %1923 = vmatpush3.bf16.msra.mxu1 %v2055_v28 }
 0x5a9   : > { %1924 = vmatprep.subr.bf16.mxu1 %v2288_v0 }
 0x5ac   : > { %1925 = vmatpush3.bf16.msra.mxu1 %v2056_v39 }
 0x5ad   : > { %1926 = vmatprep.subr.bf16.mxu1 %v2288_v0  ;;  %v1781_v0 = vld [vmem:[%s2831_s25] ss:$0 sm:$0xff]  ;;  %s2190_s25 = scalar_lea.vmem %s2722_s23, 128 }
 0x5ae   : > { %p2191_p1 = scmp.ne.s32.totalorder %s2722_s23, %s2190_s25  ;;  %p2198_p3 = scmp.lt.s32.totalorder %s2196_s10, %s2190_s25 }
 0x5b0   : > { %1927 = vmatpush3.bf16.msra.mxu1 %v2057_v40  ;;  %p2192_p8 = pnand %p2191_p1, %p2837_p4  ;;  %p2199_p5 = por %p2198_p3, %p2197_p11 }
 0x5b2   : > { %p2193_p10 = pneg %p2192_p8 }
 0x5b4   : > { %p2200_p6 = pnand %p2199_p5, %p2193_p10 }
 0x633   : > { %v1392_v21 = vpop.xlane.xlu0 %1391 }
 0x634   : > { %v1394_v22 = vmul.f32 0.03125, %v1392_v21 }
 0x636   : > { %v1395_v23 = vsub.f32 %v1387_v19, %v1394_v22 }
 0x638   : > { %v1396_v24 = vmul.f32 %v1395_v23, %v1395_v23 }
 0x63a   : > { %v1397_v25 = vsel %vm643_vm1, %v1396_v24, 0.0 }
 0x63b   : > { %1398 = vadd.xlane.f32.xlu1 %v1397_v25 }
 0x6c8   : > { %v1399_v29 = vpop.xlane.xlu1 %1398 }
 0x6c9   : > { %v1400_v30 = vmul.f32 0.03125, %v1399_v29 }
 0x6cb   : > { %v1401_v31 = vadd.f32 1e-05, %v1400_v30 }
 0x6cd   : > { %2074 = vrsqrt.f32 %v1401_v31 }
 0x6d7   : > { %v2075_v32 = vpop.eup %2074 }
 0x6d8   : > { %v1403_v34 = vmul.f32 %v2075_v32, %v1395_v23 }
 0x6da   : > { %v1410_v36 = vmul.f32 %v1775_v33, %v1403_v34 }
 0x6dc   : > { %v1417_v37 = vadd.f32 %v1776_v35, %v1410_v36 }
 0x6de   : > { %v1418_v38 = vpack.c.bf16 %v1417_v37, %v1417_v37 }
 0x6e0   : > { %1917 = vmatmul.mubr.msk.bf16.vlgmr.msra.gmra.mrb[24].mxu0 %vm643_vm1, %v1418_v38 }
 0x7b3   : > { %v1479_v42 = vpop.f32.mrb[24].mxu0 }
 0x7b4   : > { %v1480_v43 = vadd.f32 %v1777_v41, %v1479_v42  ;;  %v1918_v44 = vpop.f32.mrb[25].mxu0 }
 0x7b5   : > { %v1482_v45 = vpop.f32.mrb[26].mxu0 }
 0x7b6   : > { %v1485_v46 = vmax.f32 %v1480_v43, 0.0  ;;  %v1919_v47 = vpop.f32.mrb[27].mxu0 }
 0x7b8   : > { %v1486_v48 = vpack.c.bf16 %v1485_v46, %v1485_v46 }
 0x7ba   : > { %1929 = vmatmul.mubr.msk.bf16.vlgmr.msra.gmra.mrb[24].mxu1 %vm1526_vm9, %v1486_v48 }
 0x88d   : > { %v1564_v49 = vpop.f32.mrb[24].mxu1 }
 0x88e   : > { %v1565_v50 = vadd.f32 %v1781_v0, %v1564_v49  ;;  %v1930_v51 = vpop.f32.mrb[25].mxu1 }
 0x88f   : > { %v1567_v52 = vpop.f32.mrb[26].mxu1 }
 0x890   : > { %v1931_v53 = vpop.f32.mrb[27].mxu1  ;;  %v1570_v54 = vadd.f32 %v1565_v50, %v1417_v37 }
 0x892   : > { %v1573_v55 = vsel %vm643_vm1, %v1570_v54, 0.0 }
 0x893   : > { %1574 = vadd.xlane.f32.xlu0 %v1573_v55 }
 0x920   : > { %v1575_v56 = vpop.xlane.xlu0 %1574 }
 0x921   : > { %v1576_v57 = vmul.f32 0.03125, %v1575_v56 }
 0x923   : > { %v1577_v58 = vsub.f32 %v1570_v54, %v1576_v57 }
 0x925   : > { %v1578_v59 = vmul.f32 %v1577_v58, %v1577_v58 }
 0x927   : > { %v1579_v60 = vsel %vm643_vm1, %v1578_v59, 0.0 }
 0x928   : > { %1580 = vadd.xlane.f32.xlu0 %v1579_v60 }
 0x9b5   : > { %v1581_v61 = vpop.xlane.xlu0 %1580 }
 0x9b6   : > { %v1582_v62 = vmul.f32 0.03125, %v1581_v61 }
 0x9b8   : > { %v1583_v63 = vadd.f32 1e-05, %v1582_v62 }
 0x9ba   : > { %2076 = vrsqrt.f32 %v1583_v63 }
 0x9c4   : > { %v2077_v1 = vpop.eup %2076 }
 0x9c5   : > { %v1585_v4 = vmul.f32 %v2077_v1, %v1577_v58 }
 0x9c7   : > { %v1592_v6 = vmul.f32 %v1787_v2, %v1585_v4 }
 0x9c9   : > { %v1599_v7 = vadd.f32 %v1788_v5, %v1592_v6 }
 0x9cb   : > { %1600 = vst.msk [vmem:[%s608_s18] sm:$0xff] %vm643_vm1, %v1599_v7 }
 0x9cc   : > { %2203 = shalt.err (!%p2200_p6)
}
 0x9cd   : > { %s2204_s6 = scalar_lea.hbm %s2720_s20, 128  ;;  %s2208_s19 = scalar_lea.hbm %s2836_s22, 256 }
 0x9ce   : > { %p2205_p7 = scmp.ne.s32.totalorder %s2720_s20, %s2204_s6  ;;  %p2209_p0 = scmp.lt.u32.totalorder %s2720_s20, %s2836_s22 }
 0x9cf   : > { %p2210_p2 = scmp.lt.u32.totalorder %s2208_s19, %s2204_s6  ;;  %p2212_p1 = scmp.lt.u32.totalorder %s2204_s6, %s2720_s20 }
 0x9d0   : > { %p2206_p9 = pnand %p2205_p7, %p2837_p4 }
 0x9d1   : > { %p2211_p13 = por %p2210_p2, %p2209_p0 }
 0x9d2   : > { %p2207_p12 = pneg %p2206_p9 }
 0x9d3   : > { %p2213_p8 = por %p2212_p1, %p2211_p13 }
 0x9d5   : > { %p2214_p10 = pnand %p2213_p8, %p2207_p12 }
 0x9d7   : > { %2217 = shalt.err (!%p2214_p10)
}
 0x9d8   : > { %1948 = dma.vmem_to_hbm [thread:$0]  (%p2837_p4), %s2722_s23, 128, %s2720_s20, %s1602_s28  }
 0x9d9 PF: > { %s2838_s16 = sld [smem:[#allocation22_spill]]  ;;  %s2839_s26 = sld [smem:[#allocation18_spill]] }
 0x9da   : > { %s2840_s18 = sld [smem:[#allocation25_spill]] }
 0x9df   : > { %p1975_p11 = scmp.ge.s32.totalorder %s2838_s16, 2  ;;  %s1628_s30 = sand.u32 1, %s2839_s26  }
 0x9e0   : > { %p2841_p3 = scmp.ne.s32.totalorder %s2840_s18, 0  ;;  %s1629_s24 = scalar_lea.sflag [#allocation7], %s1628_s30 }
 0x9e2   : > { %p1964_p5 = pnand %p1975_p11, %p2841_p3 }
 0x9e4   : > { %2255 = dma.done.wait (!%p1964_p5), %s1629_s24, 128  }
 0x9e5   : > { %2257 = vsyncadd (!%p1964_p5), %s1629_s24, 4294967168  ;;  %s33_s29 = sadd.s32 1, %s2838_s16   ;;  %s2842_s24 = sld [smem:[#allocation19_spill]] }
 0x9e6   : > { %p30_p6 = scmp.ge.s32.totalorder %s33_s29, 4   ;;  %s2843_s25 = sld [smem:[#allocation20_spill]] }
 0x9e7   : > { %s2844_s26 = sld [smem:[#allocation26_spill]]  ;;  %s2845_s27 = sld [smem:[#allocation21_spill]] }
 0x9e8   : > { %s2846_s28 = sld [smem:[#allocation23_spill]]  ;;  %32 = sbr.rel (!%p30_p6) target bundleno = 16 (0x10), region = 145 }
 0x9ef   :  { %1634 = vsyncpa [#allocation6], 1 }
 0x9f0   :  { %1636 = vsyncpa [#allocation6 + $0x1], 1 }
 0x9f1   :  { %1637 = vsyncpa [#allocation9], 1 }
 0x9f2   :  { %1638 = vsyncpa [#allocation12], 1 }
 0x9f3   :  { %1639 = vsyncpa [#allocation7], 1 }
 0x9f4   :  { %1641 = vsyncpa [#allocation7 + $0x1], 1 }

</bundles_post_ra>
